<compile_context>
chip_gen: v5e
topology: v5e:2x2
jax: 0.10.0
libtpu: 0.0.40
codegen_flags: <defaults>
</compile_context>

<pallas_src>
import functools

import jax
import jax.numpy as jnp
import numpy as np
from jax.experimental import pallas as pl
from jax.experimental.pallas import tpu as pltpu


# ----------------------------- helpers -------------------------------------

def _round_up(x, m):
    return ((x + m - 1) // m) * m


def _pad2d(x, rows, cols):
    r, c = x.shape
    return jnp.pad(x, ((0, rows - r), (0, cols - c)))


_COMPILER_PARAMS = pltpu.CompilerParams(
    dimension_semantics=("parallel",),          # shard M-tiles across TCs (v7x)
    vmem_limit_bytes=32 * 1024 * 1024,          # safe on v5e/v6e/v7x
)


# ----------------------------- Pallas kernels ------------------------------

def _matmul_bias_act_kernel(a_ref, w_ref, b_ref, o_ref, *, relu):
    # a: (tm, Kp) bf16, w: (Kp, Np) bf16, b: (1, Np) f32 -> o: (tm, Np)
    acc = jnp.dot(a_ref[...], w_ref[...], preferred_element_type=jnp.float32)
    acc = acc + b_ref[...]
    if relu:
        acc = jnp.maximum(acc, 0.0)
    o_ref[...] = acc.astype(o_ref.dtype)


def matmul_bias_act(a, w_p, b_p, n_valid, *, relu, out_dtype=jnp.float32,
                    tm=256):
    """act(a @ w + b). w_p/b_p are pre-padded (bf16 / f32). M-tiled grid."""
    M, K = a.shape
    Kp, Np = w_p.shape
    tm_eff = min(tm, _round_up(M, 8))
    Mp = _round_up(M, tm_eff)
    a_p = jnp.pad(a.astype(jnp.bfloat16), ((0, Mp - M), (0, Kp - K)))

    out = pl.pallas_call(
        functools.partial(_matmul_bias_act_kernel, relu=relu),
        out_shape=jax.ShapeDtypeStruct((Mp, Np), out_dtype),
        grid=(Mp // tm_eff,),
        in_specs=[
            pl.BlockSpec((tm_eff, Kp), lambda i: (i, 0)),   # streamed over M
            pl.BlockSpec((Kp, Np), lambda i: (0, 0)),       # weights resident
            pl.BlockSpec((1, Np), lambda i: (0, 0)),        # bias resident
        ],
        out_specs=pl.BlockSpec((tm_eff, Np), lambda i: (i, 0)),
        compiler_params=_COMPILER_PARAMS,
    )(a_p, w_p, b_p)
    return out[:M, :n_valid]


def _fc_fused_kernel(x_ref, w1_ref, b1_ref, w2_ref, b2_ref, o_ref):
    # h = relu(x @ W1 + b1) stays on-chip; o = h @ W2 + b2.
    h = jnp.dot(x_ref[...], w1_ref[...], preferred_element_type=jnp.float32)
    h = jnp.maximum(h + b1_ref[...], 0.0)
    out = jnp.dot(h.astype(jnp.bfloat16), w2_ref[...],
                  preferred_element_type=jnp.float32)
    o_ref[...] = (out + b2_ref[...]).astype(o_ref.dtype)


def fc_fused(x, w1_p, b1_p, w2_p, b2_p, n_out, *, tm=256):
    M, K = x.shape
    K1p, H1p = w1_p.shape
    K2p, N2p = w2_p.shape
    assert H1p == K2p
    tm_eff = min(tm, _round_up(M, 8))
    Mp = _round_up(M, tm_eff)
    x_p = jnp.pad(x.astype(jnp.bfloat16), ((0, Mp - M), (0, K1p - K)))

    out = pl.pallas_call(
        _fc_fused_kernel,
        out_shape=jax.ShapeDtypeStruct((Mp, N2p), jnp.float32),
        grid=(Mp // tm_eff,),
        in_specs=[
            pl.BlockSpec((tm_eff, K1p), lambda i: (i, 0)),
            pl.BlockSpec((K1p, H1p), lambda i: (0, 0)),
            pl.BlockSpec((1, H1p), lambda i: (0, 0)),
            pl.BlockSpec((K2p, N2p), lambda i: (0, 0)),
            pl.BlockSpec((1, N2p), lambda i: (0, 0)),
        ],
        out_specs=pl.BlockSpec((tm_eff, N2p), lambda i: (i, 0)),
        compiler_params=_COMPILER_PARAMS,
    )(x_p, w1_p, b1_p, w2_p, b2_p)
    return out[:M, :n_out]


# ----------------------------- conv / pool glue (NHWC) ----------------------

def _im2col_nhwc(x, kh, kw):
    # x: (N, H, W, C) -> patches: (N*Ho*Wo, kh*kw*C), K-order (kh, kw, C)
    N, H, W, C = x.shape
    Ho, Wo = H - kh + 1, W - kw + 1
    cols = [x[:, di:di + Ho, dj:dj + Wo, :]
            for di in range(kh) for dj in range(kw)]
    patches = jnp.stack(cols, axis=3)                 # (N, Ho, Wo, kh*kw, C)
    return patches.reshape(N * Ho * Wo, kh * kw * C), Ho, Wo


def conv2d_relu_nhwc(x, w_p, b_p, *, cout, kh, kw, padding=0, tm=256):
    if padding:
        x = jnp.pad(x, ((0, 0), (padding, padding), (padding, padding), (0, 0)))
    N = x.shape[0]
    patches, Ho, Wo = _im2col_nhwc(x, kh, kw)
    out2d = matmul_bias_act(patches, w_p, b_p, cout, relu=True,
                            out_dtype=jnp.bfloat16, tm=tm)
    return out2d.reshape(N, Ho, Wo, cout)


def maxpool2x2_nhwc(x):
    # Plain JAX on purpose (perf review): XLA fuses the 4 strided views + max;
    # a standalone Pallas launch for a few KiB of data costs more than the op.
    return jnp.maximum(
        jnp.maximum(x[:, ::2, ::2, :], x[:, ::2, 1::2, :]),
        jnp.maximum(x[:, 1::2, ::2, :], x[:, 1::2, 1::2, :]),
    )


# ----------------------------- params ---------------------------------------

def init_params(key):
    def conv_init(key, cout, cin, kh, kw):
        kw_, kb_ = jax.random.split(key)
        fan_in = cin * kh * kw
        bound = 1.0 / jnp.sqrt(fan_in)
        w = jax.random.uniform(kw_, (cout, cin, kh, kw), jnp.float32, -bound, bound)
        b = jax.random.uniform(kb_, (cout,), jnp.float32, -bound, bound)
        return w, b

    def linear_init(key, cout, cin):
        kw_, kb_ = jax.random.split(key)
        bound = 1.0 / jnp.sqrt(cin)
        w = jax.random.uniform(kw_, (cout, cin), jnp.float32, -bound, bound)
        b = jax.random.uniform(kb_, (cout,), jnp.float32, -bound, bound)
        return w, b

    k1, k2, k3, k4, k5 = jax.random.split(key, 5)
    return {
        "conv1": conv_init(k1, 20, 1, 5, 5),
        "conv2": conv_init(k2, 50, 20, 5, 5),
        "conv3": conv_init(k3, 50, 50, 3, 3),
        "fc1": linear_init(k4, 500, 2 * 2 * 50),
        "fc2": linear_init(k5, 10, 500),
    }


def prepare_params(params):
    """One-time reshape/transpose/pad/cast of all weights for the kernels."""
    def prep_conv(w, b):
        cout, cin, kh, kw = w.shape
        k = kh * kw * cin
        w2 = w.transpose(2, 3, 1, 0).reshape(k, cout)   # K-order (kh, kw, cin)
        kp, np_ = _round_up(k, 128), _round_up(cout, 128)
        return (_pad2d(w2, kp, np_).astype(jnp.bfloat16),
                _pad2d(b.astype(jnp.float32).reshape(1, -1), 1, np_))

    c1_w, c1_b = prep_conv(*params["conv1"])
    c2_w, c2_b = prep_conv(*params["conv2"])
    c3_w, c3_b = prep_conv(*params["conv3"])

    fw1, fb1 = params["fc1"]
    fw2, fb2 = params["fc2"]
    # PyTorch flattens (C, H, W); our NHWC activations flatten (H, W, C).
    # Permute fc1's input columns once here instead of transposing activations.
    C, H, W = 50, 2, 2
    fw1_hwc = fw1.reshape(-1, C, H, W).transpose(0, 2, 3, 1).reshape(-1, C * H * W)
    k1, h1 = C * H * W, fw1.shape[0]                    # 200, 500
    k1p, h1p = _round_up(k1, 128), _round_up(h1, 128)   # 256, 512
    n2p = _round_up(fw2.shape[0], 128)                  # 128

    return {
        "c1_w": c1_w, "c1_b": c1_b,
        "c2_w": c2_w, "c2_b": c2_b,
        "c3_w": c3_w, "c3_b": c3_b,
        "fc1_w": _pad2d(fw1_hwc.T, k1p, h1p).astype(jnp.bfloat16),
        "fc1_b": _pad2d(fb1.astype(jnp.float32).reshape(1, -1), 1, h1p),
        "fc2_w": _pad2d(fw2.T, h1p, n2p).astype(jnp.bfloat16),
        "fc2_b": _pad2d(fb2.astype(jnp.float32).reshape(1, -1), 1, n2p),
    }


# ----------------------------- the model ------------------------------------

@jax.jit
def net3conv_forward(p, x_nchw):
    # x: (N, 1, 28, 28) float32 NCHW (as in PyTorch); converted to NHWC once.
    x = jnp.transpose(x_nchw, (0, 2, 3, 1)).astype(jnp.bfloat16)
    x = conv2d_relu_nhwc(x, p["c1_w"], p["c1_b"], cout=20, kh=5, kw=5)  # (N,24,24,20)
    x = maxpool2x2_nhwc(x)                                              # (N,12,12,20)
    x = conv2d_relu_nhwc(x, p["c2_w"], p["c2_b"], cout=50, kh=5, kw=5)  # (N, 8, 8,50)
    x = maxpool2x2_nhwc(x)                                              # (N, 4, 4,50)
    x = conv2d_relu_nhwc(x, p["c3_w"], p["c3_b"], cout=50, kh=3, kw=3,
                         padding=1)                                     # (N, 4, 4,50)
    x = maxpool2x2_nhwc(x)                                              # (N, 2, 2,50)
    x = x.reshape(x.shape[0], -1)     # (N, 200) in (H, W, C) order; fc1 permuted
    return fc_fused(x, p["fc1_w"], p["fc1_b"], p["fc2_w"], p["fc2_b"], n_out=10)


# ----------------------------- reference (pure JAX, f32) ---------------------

def _reference_forward(params, x):
    w1, b1 = params["conv1"]; w2, b2 = params["conv2"]; w3, b3 = params["conv3"]
    fw1, fb1 = params["fc1"]; fw2, fb2 = params["fc2"]

    def conv(x, w, b, pad):
        y = jax.lax.conv_general_dilated(
            x, w, window_strides=(1, 1), padding=[(pad, pad), (pad, pad)],
            dimension_numbers=("NCHW", "OIHW", "NCHW"))
        return jax.nn.relu(y + b[None, :, None, None])

    def pool(x):
        return jax.lax.reduce_window(x, -jnp.inf, jax.lax.max,
                                     (1, 1, 2, 2), (1, 1, 2, 2), "VALID")

    x = pool(conv(x, w1, b1, 0))
    x = pool(conv(x, w2, b2, 0))
    x = pool(conv(x, w3, b3, 1))
    x = x.reshape(x.shape[0], -1)
    x = jax.nn.relu(x @ fw1.T + fb1)
    return x @ fw2.T + fb2


if __name__ == "__main__":
    key = jax.random.PRNGKey(0)
    pkey, xkey = jax.random.split(key)
    params = init_params(pkey)
    prepped = prepare_params(params)
    # The 2*2*50 flatten forces a 28x28 (MNIST-style) input; small batch.
    x = jax.random.normal(xkey, (2, 1, 28, 28), dtype=jnp.float32)

    out = net3conv_forward(prepped, x)
    jax.block_until_ready(out)
    assert out.shape == (2, 10)

    ref = _reference_forward(params, x)
    np.testing.assert_allclose(np.asarray(out), np.asarray(ref),
                               rtol=0.1, atol=0.1)   # bf16-operand tolerance
    print("KERNEL_OK")
</pallas_src>

<mosaic_0001>
module attributes {stable_mosaic.version = 11 : i64} {
  func.func @_matmul_bias_act_kernel(%arg0: i32, %arg1: memref<256x128xbf16, #tpu.memory_space<vmem>>, %arg2: memref<128x128xbf16, #tpu.memory_space<vmem>>, %arg3: memref<1x128xf32, #tpu.memory_space<vmem>>, %arg4: memref<256x128xbf16, #tpu.memory_space<vmem>>) attributes {dimension_semantics = [#tpu.dimension_semantics<parallel>], iteration_bounds = array<i64: 5>, scalar_prefetch = 0 : i64, scratch_operands = 0 : i64, tpu.core_type = #tpu.core_type<tc>, window_params = [{transform_indices = @transform_0, window_bounds = array<i64: 256, 128>}, {pipeline_mode = #tpu.pipeline_mode<synchronous>, transform_indices = @transform_1, window_bounds = array<i64: 128, 128>}, {pipeline_mode = #tpu.pipeline_mode<synchronous>, transform_indices = @transform_2, window_bounds = array<i64: 1, 128>}, {transform_indices = @transform_3, window_bounds = array<i64: 256, 128>}]} {
    %c0 = arith.constant 0 : index
    %c0_0 = arith.constant 0 : index
    %0 = vector.load %arg1[%c0, %c0_0] : memref<256x128xbf16, #tpu.memory_space<vmem>>, vector<256x128xbf16>
    %c0_1 = arith.constant 0 : index
    %c0_2 = arith.constant 0 : index
    %1 = vector.load %arg2[%c0_1, %c0_2] : memref<128x128xbf16, #tpu.memory_space<vmem>>, vector<128x128xbf16>
    %cst = arith.constant dense<0.000000e+00> : vector<256x128xf32>
    %2 = tpu.matmul %0, %1, %cst {dimension_numbers = #tpu.dot_dimension_numbers<[1], [0], [0], [1], [0, 0, 1, 1], [], []>} : vector<256x128xbf16>, vector<128x128xbf16>, vector<256x128xf32> -> vector<256x128xf32>
    %c0_3 = arith.constant 0 : index
    %c0_4 = arith.constant 0 : index
    %3 = vector.load %arg3[%c0_3, %c0_4] : memref<1x128xf32, #tpu.memory_space<vmem>>, vector<1x128xf32>
    %4 = vector.broadcast %3 : vector<1x128xf32> to vector<256x128xf32>
    %5 = arith.addf %2, %4 : vector<256x128xf32>
    %cst_5 = arith.constant 0.000000e+00 : f32
    %6 = vector.broadcast %cst_5 : f32 to vector<256x128xf32>
    %7 = arith.maximumf %5, %6 : vector<256x128xf32>
    %8 = arith.truncf %7 : vector<256x128xf32> to vector<256x128xbf16>
    %c0_6 = arith.constant 0 : index
    %c0_7 = arith.constant 0 : index
    %9 = vector.load %arg4[%c0_6, %c0_7] : memref<256x128xbf16, #tpu.memory_space<vmem>>, vector<256x128xbf16>
    tpu.vector_store %arg4[%c0_6, %c0_7], %8 {strides = array<i32>} : memref<256x128xbf16, #tpu.memory_space<vmem>>, vector<256x128xbf16>,
    return
  }
  func.func @transform_0(%arg0: i32) -> (i32, i32) {
    %c0_i32 = arith.constant 0 : i32
    %c0_i32_0 = arith.constant 0 : i32
    return %arg0, %c0_i32 : i32, i32
  }
  func.func @transform_1(%arg0: i32) -> (i32, i32) {
    %c0_i32 = arith.constant 0 : i32
    %c0_i32_0 = arith.constant 0 : i32
    %c0_i32_1 = arith.constant 0 : i32
    return %c0_i32, %c0_i32_0 : i32, i32
  }
  func.func @transform_2(%arg0: i32) -> (i32, i32) {
    %c0_i32 = arith.constant 0 : i32
    %c0_i32_0 = arith.constant 0 : i32
    %c0_i32_1 = arith.constant 0 : i32
    return %c0_i32, %c0_i32_0 : i32, i32
  }
  func.func @transform_3(%arg0: i32) -> (i32, i32) {
    %c0_i32 = arith.constant 0 : i32
    %c0_i32_0 = arith.constant 0 : i32
    return %arg0, %c0_i32 : i32, i32
  }
}

module attributes {stable_mosaic.version = 11 : i64} {
  func.func @_matmul_bias_act_kernel(%arg0: i32, %arg1: memref<128x512xbf16, #tpu.memory_space<vmem>>, %arg2: memref<512x128xbf16, #tpu.memory_space<vmem>>, %arg3: memref<1x128xf32, #tpu.memory_space<vmem>>, %arg4: memref<128x128xbf16, #tpu.memory_space<vmem>>) attributes {dimension_semantics = [#tpu.dimension_semantics<parallel>], iteration_bounds = array<i64: 1>, scalar_prefetch = 0 : i64, scratch_operands = 0 : i64, tpu.core_type = #tpu.core_type<tc>, window_params = [{transform_indices = @transform_0, window_bounds = array<i64: 128, 512>}, {pipeline_mode = #tpu.pipeline_mode<synchronous>, transform_indices = @transform_1, window_bounds = array<i64: 512, 128>}, {pipeline_mode = #tpu.pipeline_mode<synchronous>, transform_indices = @transform_2, window_bounds = array<i64: 1, 128>}, {transform_indices = @transform_3, window_bounds = array<i64: 128, 128>}]} {
    %c0 = arith.constant 0 : index
    %c0_0 = arith.constant 0 : index
    %0 = vector.load %arg1[%c0, %c0_0] : memref<128x512xbf16, #tpu.memory_space<vmem>>, vector<128x512xbf16>
    %c0_1 = arith.constant 0 : index
    %c0_2 = arith.constant 0 : index
    %1 = vector.load %arg2[%c0_1, %c0_2] : memref<512x128xbf16, #tpu.memory_space<vmem>>, vector<512x128xbf16>
    %cst = arith.constant dense<0.000000e+00> : vector<128x128xf32>
    %2 = tpu.matmul %0, %1, %cst {dimension_numbers = #tpu.dot_dimension_numbers<[1], [0], [0], [1], [0, 0, 1, 1], [], []>} : vector<128x512xbf16>, vector<512x128xbf16>, vector<128x128xf32> -> vector<128x128xf32>
    %c0_3 = arith.constant 0 : index
    %c0_4 = arith.constant 0 : index
    %3 = vector.load %arg3[%c0_3, %c0_4] : memref<1x128xf32, #tpu.memory_space<vmem>>, vector<1x128xf32>
    %4 = vector.broadcast %3 : vector<1x128xf32> to vector<128x128xf32>
    %5 = arith.addf %2, %4 : vector<128x128xf32>
    %cst_5 = arith.constant 0.000000e+00 : f32
    %6 = vector.broadcast %cst_5 : f32 to vector<128x128xf32>
    %7 = arith.maximumf %5, %6 : vector<128x128xf32>
    %8 = arith.truncf %7 : vector<128x128xf32> to vector<128x128xbf16>
    %c0_6 = arith.constant 0 : index
    %c0_7 = arith.constant 0 : index
    %9 = vector.load %arg4[%c0_6, %c0_7] : memref<128x128xbf16, #tpu.memory_space<vmem>>, vector<128x128xbf16>
    tpu.vector_store %arg4[%c0_6, %c0_7], %8 {strides = array<i32>} : memref<128x128xbf16, #tpu.memory_space<vmem>>, vector<128x128xbf16>,
    return
  }
  func.func @transform_0(%arg0: i32) -> (i32, i32) {
    %c0_i32 = arith.constant 0 : i32
    %c0_i32_0 = arith.constant 0 : i32
    return %arg0, %c0_i32 : i32, i32
  }
  func.func @transform_1(%arg0: i32) -> (i32, i32) {
    %c0_i32 = arith.constant 0 : i32
    %c0_i32_0 = arith.constant 0 : i32
    %c0_i32_1 = arith.constant 0 : i32
    return %c0_i32, %c0_i32_0 : i32, i32
  }
  func.func @transform_2(%arg0: i32) -> (i32, i32) {
    %c0_i32 = arith.constant 0 : i32
    %c0_i32_0 = arith.constant 0 : i32
    %c0_i32_1 = arith.constant 0 : i32
    return %c0_i32, %c0_i32_0 : i32, i32
  }
  func.func @transform_3(%arg0: i32) -> (i32, i32) {
    %c0_i32 = arith.constant 0 : i32
    %c0_i32_0 = arith.constant 0 : i32
    return %arg0, %c0_i32 : i32, i32
  }
}

module attributes {stable_mosaic.version = 11 : i64} {
  func.func @_matmul_bias_act_kernel(%arg0: i32, %arg1: memref<32x512xbf16, #tpu.memory_space<vmem>>, %arg2: memref<512x128xbf16, #tpu.memory_space<vmem>>, %arg3: memref<1x128xf32, #tpu.memory_space<vmem>>, %arg4: memref<32x128xbf16, #tpu.memory_space<vmem>>) attributes {dimension_semantics = [#tpu.dimension_semantics<parallel>], iteration_bounds = array<i64: 1>, scalar_prefetch = 0 : i64, scratch_operands = 0 : i64, tpu.core_type = #tpu.core_type<tc>, window_params = [{transform_indices = @transform_0, window_bounds = array<i64: 32, 512>}, {pipeline_mode = #tpu.pipeline_mode<synchronous>, transform_indices = @transform_1, window_bounds = array<i64: 512, 128>}, {pipeline_mode = #tpu.pipeline_mode<synchronous>, transform_indices = @transform_2, window_bounds = array<i64: 1, 128>}, {transform_indices = @transform_3, window_bounds = array<i64: 32, 128>}]} {
    %c0 = arith.constant 0 : index
    %c0_0 = arith.constant 0 : index
    %0 = vector.load %arg1[%c0, %c0_0] : memref<32x512xbf16, #tpu.memory_space<vmem>>, vector<32x512xbf16>
    %c0_1 = arith.constant 0 : index
    %c0_2 = arith.constant 0 : index
    %1 = vector.load %arg2[%c0_1, %c0_2] : memref<512x128xbf16, #tpu.memory_space<vmem>>, vector<512x128xbf16>
    %cst = arith.constant dense<0.000000e+00> : vector<32x128xf32>
    %2 = tpu.matmul %0, %1, %cst {dimension_numbers = #tpu.dot_dimension_numbers<[1], [0], [0], [1], [0, 0, 1, 1], [], []>} : vector<32x512xbf16>, vector<512x128xbf16>, vector<32x128xf32> -> vector<32x128xf32>
    %c0_3 = arith.constant 0 : index
    %c0_4 = arith.constant 0 : index
    %3 = vector.load %arg3[%c0_3, %c0_4] : memref<1x128xf32, #tpu.memory_space<vmem>>, vector<1x128xf32>
    %4 = vector.broadcast %3 : vector<1x128xf32> to vector<32x128xf32>
    %5 = arith.addf %2, %4 : vector<32x128xf32>
    %cst_5 = arith.constant 0.000000e+00 : f32
    %6 = vector.broadcast %cst_5 : f32 to vector<32x128xf32>
    %7 = arith.maximumf %5, %6 : vector<32x128xf32>
    %8 = arith.truncf %7 : vector<32x128xf32> to vector<32x128xbf16>
    %c0_6 = arith.constant 0 : index
    %c0_7 = arith.constant 0 : index
    %9 = vector.load %arg4[%c0_6, %c0_7] : memref<32x128xbf16, #tpu.memory_space<vmem>>, vector<32x128xbf16>
    tpu.vector_store %arg4[%c0_6, %c0_7], %8 {strides = array<i32>} : memref<32x128xbf16, #tpu.memory_space<vmem>>, vector<32x128xbf16>,
    return
  }
  func.func @transform_0(%arg0: i32) -> (i32, i32) {
    %c0_i32 = arith.constant 0 : i32
    %c0_i32_0 = arith.constant 0 : i32
    return %arg0, %c0_i32 : i32, i32
  }
  func.func @transform_1(%arg0: i32) -> (i32, i32) {
    %c0_i32 = arith.constant 0 : i32
    %c0_i32_0 = arith.constant 0 : i32
    %c0_i32_1 = arith.constant 0 : i32
    return %c0_i32, %c0_i32_0 : i32, i32
  }
  func.func @transform_2(%arg0: i32) -> (i32, i32) {
    %c0_i32 = arith.constant 0 : i32
    %c0_i32_0 = arith.constant 0 : i32
    %c0_i32_1 = arith.constant 0 : i32
    return %c0_i32, %c0_i32_0 : i32, i32
  }
  func.func @transform_3(%arg0: i32) -> (i32, i32) {
    %c0_i32 = arith.constant 0 : i32
    %c0_i32_0 = arith.constant 0 : i32
    return %arg0, %c0_i32 : i32, i32
  }
}

module attributes {stable_mosaic.version = 11 : i64} {
  func.func @_fc_fused_kernel(%arg0: i32, %arg1: memref<8x256xbf16, #tpu.memory_space<vmem>>, %arg2: memref<256x512xbf16, #tpu.memory_space<vmem>>, %arg3: memref<1x512xf32, #tpu.memory_space<vmem>>, %arg4: memref<512x128xbf16, #tpu.memory_space<vmem>>, %arg5: memref<1x128xf32, #tpu.memory_space<vmem>>, %arg6: memref<8x128xf32, #tpu.memory_space<vmem>>) attributes {dimension_semantics = [#tpu.dimension_semantics<parallel>], iteration_bounds = array<i64: 1>, scalar_prefetch = 0 : i64, scratch_operands = 0 : i64, tpu.core_type = #tpu.core_type<tc>, window_params = [{transform_indices = @transform_0, window_bounds = array<i64: 8, 256>}, {pipeline_mode = #tpu.pipeline_mode<synchronous>, transform_indices = @transform_1, window_bounds = array<i64: 256, 512>}, {pipeline_mode = #tpu.pipeline_mode<synchronous>, transform_indices = @transform_2, window_bounds = array<i64: 1, 512>}, {pipeline_mode = #tpu.pipeline_mode<synchronous>, transform_indices = @transform_3, window_bounds = array<i64: 512, 128>}, {pipeline_mode = #tpu.pipeline_mode<synchronous>, transform_indices = @transform_4, window_bounds = array<i64: 1, 128>}, {transform_indices = @transform_5, window_bounds = array<i64: 8, 128>}]} {
    %c0 = arith.constant 0 : index
    %c0_0 = arith.constant 0 : index
    %0 = vector.load %arg1[%c0, %c0_0] : memref<8x256xbf16, #tpu.memory_space<vmem>>, vector<8x256xbf16>
    %c0_1 = arith.constant 0 : index
    %c0_2 = arith.constant 0 : index
    %1 = vector.load %arg2[%c0_1, %c0_2] : memref<256x512xbf16, #tpu.memory_space<vmem>>, vector<256x512xbf16>
    %cst = arith.constant dense<0.000000e+00> : vector<8x512xf32>
    %2 = tpu.matmul %0, %1, %cst {dimension_numbers = #tpu.dot_dimension_numbers<[1], [0], [0], [1], [0, 0, 1, 1], [], []>} : vector<8x256xbf16>, vector<256x512xbf16>, vector<8x512xf32> -> vector<8x512xf32>
    %c0_3 = arith.constant 0 : index
    %c0_4 = arith.constant 0 : index
    %3 = vector.load %arg3[%c0_3, %c0_4] : memref<1x512xf32, #tpu.memory_space<vmem>>, vector<1x512xf32>
    %4 = vector.broadcast %3 : vector<1x512xf32> to vector<8x512xf32>
    %5 = arith.addf %2, %4 : vector<8x512xf32>
    %cst_5 = arith.constant 0.000000e+00 : f32
    %6 = vector.broadcast %cst_5 : f32 to vector<8x512xf32>
    %7 = arith.maximumf %5, %6 : vector<8x512xf32>
    %8 = arith.truncf %7 : vector<8x512xf32> to vector<8x512xbf16>
    %c0_6 = arith.constant 0 : index
    %c0_7 = arith.constant 0 : index
    %9 = vector.load %arg4[%c0_6, %c0_7] : memref<512x128xbf16, #tpu.memory_space<vmem>>, vector<512x128xbf16>
    %cst_8 = arith.constant dense<0.000000e+00> : vector<8x128xf32>
    %10 = tpu.matmul %8, %9, %cst_8 {dimension_numbers = #tpu.dot_dimension_numbers<[1], [0], [0], [1], [0, 0, 1, 1], [], []>} : vector<8x512xbf16>, vector<512x128xbf16>, vector<8x128xf32> -> vector<8x128xf32>
    %c0_9 = arith.constant 0 : index
    %c0_10 = arith.constant 0 : index
    %11 = vector.load %arg5[%c0_9, %c0_10] : memref<1x128xf32, #tpu.memory_space<vmem>>, vector<1x128xf32>
    %12 = vector.broadcast %11 : vector<1x128xf32> to vector<8x128xf32>
    %13 = arith.addf %10, %12 : vector<8x128xf32>
    %c0_11 = arith.constant 0 : index
    %c0_12 = arith.constant 0 : index
    %14 = vector.load %arg6[%c0_11, %c0_12] : memref<8x128xf32, #tpu.memory_space<vmem>>, vector<8x128xf32>
    tpu.vector_store %arg6[%c0_11, %c0_12], %13 {strides = array<i32>} : memref<8x128xf32, #tpu.memory_space<vmem>>, vector<8x128xf32>,
    return
  }
  func.func @transform_0(%arg0: i32) -> (i32, i32) {
    %c0_i32 = arith.constant 0 : i32
    %c0_i32_0 = arith.constant 0 : i32
    return %arg0, %c0_i32 : i32, i32
  }
  func.func @transform_1(%arg0: i32) -> (i32, i32) {
    %c0_i32 = arith.constant 0 : i32
    %c0_i32_0 = arith.constant 0 : i32
    %c0_i32_1 = arith.constant 0 : i32
    return %c0_i32, %c0_i32_0 : i32, i32
  }
  func.func @transform_2(%arg0: i32) -> (i32, i32) {
    %c0_i32 = arith.constant 0 : i32
    %c0_i32_0 = arith.constant 0 : i32
    %c0_i32_1 = arith.constant 0 : i32
    return %c0_i32, %c0_i32_0 : i32, i32
  }
  func.func @transform_3(%arg0: i32) -> (i32, i32) {
    %c0_i32 = arith.constant 0 : i32
    %c0_i32_0 = arith.constant 0 : i32
    %c0_i32_1 = arith.constant 0 : i32
    return %c0_i32, %c0_i32_0 : i32, i32
  }
  func.func @transform_4(%arg0: i32) -> (i32, i32) {
    %c0_i32 = arith.constant 0 : i32
    %c0_i32_0 = arith.constant 0 : i32
    %c0_i32_1 = arith.constant 0 : i32
    return %c0_i32, %c0_i32_0 : i32, i32
  }
  func.func @transform_5(%arg0: i32) -> (i32, i32) {
    %c0_i32 = arith.constant 0 : i32
    %c0_i32_0 = arith.constant 0 : i32
    return %arg0, %c0_i32 : i32, i32
  }
}

</mosaic_0001>

<bundles_post_ra>
// kernel: net3conv_forward.4
= control target key start
LH: loop header
LB: loop body
LE: loop exit
PB: predicated region body
PF: predicated region fallthrough
CT: control target
= control target key end

     0   :  { %s898_s12 = smov 0   ;;  %s1019_s0 = inlined_call_operand.vmem [shape: bf16[1280,128], index: 0, kind: input, shape index: {}]   ;;  %s1020_s1 = inlined_call_operand.vmem [shape: bf16[128,128], index: 1, kind: input, shape index: {}]   ;;  %s1021_s2 = inlined_call_operand.vmem [shape: f32[1,128], index: 2, kind: input, shape index: {}]   ;;  %s1022_s3 = inlined_call_operand.vmem [shape: bf16[1280,128], index: 3, kind: output, shape index: {}]  }
   0x1 LB: > { %s611_s13 = sadd.s32 4294967295, %s876_s12   ;;  %p615_p0 = scmp.ge.s32.totalorder %s876_s12, 1  ;;  %s876_s12 = sphi %s898_s12, %s13_s12  }
   0x2   : > { %p138_p1 = scmp.lt.s32.totalorder %s876_s12, 6 }
   0x4   : > { %p139_p2 = pnand %p615_p0, %p138_p1 }
   0x5   : > { %s616_s22 = sshll.u32 (!%p139_p2), %s611_s13, 5 }
   0x6   : > { %142 = sbr.rel (%p139_p2) target bundleno = 240 (0xf0), region = 32  ;;  %p163_p3 = scmp.lt.s32.totalorder (!%p139_p2), %s616_s22, 159 }
   0xb   : > { %v741_v0 = vld [vmem:[%s1020_s1 + $0x38] sm:$0xff]  ;;  %v740_v1 = vld [vmem:[%s1020_s1 + $0x30] sm:$0xff]  ;;  %v739_v2 = vld [vmem:[%s1020_s1 + $0x28] sm:$0xff]  ;;  %s1024_s22 = smov (!%p163_p3, %s616_s22), 159 }
   0xc   : > { %370 = vmatpush.bf16.msra.mxu0 %v741_v0  ;;  %837 = vmatpush.bf16.msra.mxu1 %v741_v0  ;;  %v738_v3 = vld [vmem:[%s1020_s1 + $0x20] sm:$0xff]  ;;  %v737_v4 = vld [vmem:[%s1020_s1 + $0x18] sm:$0xff]  ;;  %v736_v5 = vld [vmem:[%s1020_s1 + $0x10] sm:$0xff]  ;;  %s617_s29 = sshll.u32 %s1024_s22, 2 }
   0xd   : > { %838 = vmatpush.bf16.msra.mxu2 %v741_v0  ;;  %839 = vmatpush.bf16.msra.mxu3 %v741_v0  ;;  %v735_v6 = vld [vmem:[%s1020_s1 + $0x8] sm:$0xff]  ;;  %v734_v7 = vld [vmem:[%s1020_s1] sm:$0xff]  ;;  %s938_s7 = scalar_lea.vmem %s1019_s0, %s617_s29  ;;  %s970_s13 = scalar_lea.vmem %s1022_s3, %s617_s29 }
   0xe   : > { %v718_v8 = vld [vmem:[%s938_s7] sm:$0xff]  ;;  %v719_v12 = vld [vmem:[%s938_s7 + $0x8] sm:$0xff]  ;;  %v720_v16 = vld [vmem:[%s938_s7 + $0x10] sm:$0xff] }
   0xf   : > { %v722_v9 = vld [vmem:[%s938_s7 + $0x20] sm:$0xff]  ;;  %v723_v13 = vld [vmem:[%s938_s7 + $0x28] sm:$0xff]  ;;  %v724_v17 = vld [vmem:[%s938_s7 + $0x30] sm:$0xff] }
  0x10   : > { %371 = vmatpush.bf16.msra.mxu0 %v740_v1  ;;  %840 = vmatpush.bf16.msra.mxu1 %v740_v1  ;;  %v726_v10 = vld [vmem:[%s938_s7 + $0x40] sm:$0xff]  ;;  %v727_v14 = vld [vmem:[%s938_s7 + $0x48] sm:$0xff]  ;;  %v728_v18 = vld [vmem:[%s938_s7 + $0x50] sm:$0xff] }
  0x11   : > { %841 = vmatpush.bf16.msra.mxu2 %v740_v1  ;;  %842 = vmatpush.bf16.msra.mxu3 %v740_v1  ;;  %v730_v11 = vld [vmem:[%s938_s7 + $0x60] sm:$0xff]  ;;  %v731_v15 = vld [vmem:[%s938_s7 + $0x68] sm:$0xff]  ;;  %v732_v19 = vld [vmem:[%s938_s7 + $0x70] sm:$0xff] }
  0x12   : > { %v721_v20 = vld [vmem:[%s938_s7 + $0x18] sm:$0xff]  ;;  %v959_v26 = vld [vmem:[%s1021_s2] ss:$0 sm:$0xff] }
  0x13   : > { %v725_v21 = vld [vmem:[%s938_s7 + $0x38] sm:$0xff] }
  0x14   : > { %372 = vmatpush.bf16.msra.mxu0 %v739_v2  ;;  %843 = vmatpush.bf16.msra.mxu1 %v739_v2  ;;  %v729_v22 = vld [vmem:[%s938_s7 + $0x58] sm:$0xff] }
  0x15   : > { %844 = vmatpush.bf16.msra.mxu2 %v739_v2  ;;  %845 = vmatpush.bf16.msra.mxu3 %v739_v2  ;;  %v733_v23 = vld [vmem:[%s938_s7 + $0x78] sm:$0xff] }
  0x18   : > { %373 = vmatpush.bf16.msra.mxu0 %v738_v3  ;;  %846 = vmatpush.bf16.msra.mxu1 %v738_v3 }
  0x19   : > { %847 = vmatpush.bf16.msra.mxu2 %v738_v3  ;;  %848 = vmatpush.bf16.msra.mxu3 %v738_v3 }
  0x1c   : > { %374 = vmatpush.bf16.msra.mxu0 %v737_v4  ;;  %849 = vmatpush.bf16.msra.mxu1 %v737_v4 }
  0x1d   : > { %850 = vmatpush.bf16.msra.mxu2 %v737_v4  ;;  %851 = vmatpush.bf16.msra.mxu3 %v737_v4 }
  0x20   : > { %375 = vmatpush.bf16.msra.mxu0 %v736_v5  ;;  %852 = vmatpush.bf16.msra.mxu1 %v736_v5 }
  0x21   : > { %853 = vmatpush.bf16.msra.mxu2 %v736_v5  ;;  %854 = vmatpush.bf16.msra.mxu3 %v736_v5 }
  0x24   : > { %376 = vmatpush.bf16.msra.mxu0 %v735_v6  ;;  %855 = vmatpush.bf16.msra.mxu1 %v735_v6 }
  0x25   : > { %856 = vmatpush.bf16.msra.mxu2 %v735_v6  ;;  %857 = vmatpush.bf16.msra.mxu3 %v735_v6 }
  0x28   : > { %377 = vmatpush.bf16.msra.mxu0 %v734_v7  ;;  %858 = vmatpush.bf16.msra.mxu1 %v734_v7 }
  0x29   : > { %859 = vmatpush.bf16.msra.mxu2 %v734_v7  ;;  %860 = vmatpush.bf16.msra.mxu3 %v734_v7 }
  0x2b   : > { %378 = vmatmul.bf16.vlgmr.msra.gmra.mxu0 %v718_v8  ;;  %398 = vmatmul.bf16.vlgmr.msra.gmra.mxu1 %v722_v9 }
  0x2c   : > { %418 = vmatmul.bf16.vlgmr.msra.gmra.mxu2 %v726_v10  ;;  %438 = vmatmul.bf16.vlgmr.msra.gmra.mxu3 %v730_v11 }
  0x3b   : > { %383 = vmatmul.bf16.gmra.mxu0 %v719_v12  ;;  %403 = vmatmul.bf16.gmra.mxu1 %v723_v13 }
  0x3c   : > { %423 = vmatmul.bf16.gmra.mxu2 %v727_v14  ;;  %443 = vmatmul.bf16.gmra.mxu3 %v731_v15 }
  0x4b   : > { %388 = vmatmul.bf16.gmra.mxu0 %v720_v16  ;;  %408 = vmatmul.bf16.gmra.mxu1 %v724_v17 }
  0x4c   : > { %428 = vmatmul.bf16.gmra.mxu2 %v728_v18  ;;  %448 = vmatmul.bf16.gmra.mxu3 %v732_v19 }
  0x5b   : > { %393 = vmatmul.bf16.gmra.mxu0 %v721_v20  ;;  %413 = vmatmul.bf16.gmra.mxu1 %v725_v21 }
  0x5c   : > { %433 = vmatmul.bf16.gmra.mxu2 %v729_v22  ;;  %453 = vmatmul.bf16.gmra.mxu3 %v733_v23 }
  0xa8   : > { %v379_v24 = vpop.f32.mrf.mxu0  ;;  %v399_v25 = vpop.f32.mrf.mxu1 }
  0xa9   : > { %v380_v27 = vadd.f32 %v959_v26, %v379_v24  ;;  %v400_v28 = vadd.f32 %v959_v26, %v399_v25 }
  0xab   : > { %v459_v35 = vmax.f32 %v380_v27, 0.0  ;;  %v467_v36 = vmax.f32 %v400_v28, 0.0 }
  0xaf   : > { %v419_v29 = vpop.f32.mrf.mxu2  ;;  %v439_v30 = vpop.f32.mrf.mxu3 }
  0xb0   : > { %v381_v31 = vpop.f32.mrf.mxu0  ;;  %v401_v32 = vpop.f32.mrf.mxu1  ;;  %v420_v41 = vadd.f32 %v959_v26, %v419_v29  ;;  %v440_v42 = vadd.f32 %v959_v26, %v439_v30 }
  0xb1   : > { %v382_v33 = vadd.f32 %v959_v26, %v381_v31  ;;  %v402_v34 = vadd.f32 %v959_v26, %v401_v32 }
  0xb2   : > { %v475_v49 = vmax.f32 %v420_v41, 0.0  ;;  %v483_v50 = vmax.f32 %v440_v42, 0.0 }
  0xb3   : > { %v460_v37 = vmax.f32 %v382_v33, 0.0  ;;  %v468_v38 = vmax.f32 %v402_v34, 0.0 }
  0xb5   : > { %v745_v39 = vpack.c.bf16 %v460_v37, %v459_v35  ;;  %v765_v40 = vpack.c.bf16 %v468_v38, %v467_v36 }
  0xb7   : > { %746 = vst [vmem:[%s970_s13] sm:$0xff] %v745_v39   ;;  %v421_v43 = vpop.f32.mrf.mxu2  ;;  %v441_v44 = vpop.f32.mrf.mxu3 }
  0xb8   : > { %825 = vst [vmem:[%s970_s13 + $0x20] sm:$0xff] %v765_v40   ;;  %v422_v45 = vadd.f32 %v959_v26, %v421_v43  ;;  %v442_v46 = vadd.f32 %v959_v26, %v441_v44  ;;  %v384_v47 = vpop.f32.mrf.mxu0  ;;  %v404_v48 = vpop.f32.mrf.mxu1 }
  0xb9   : > { %v385_v55 = vadd.f32 %v959_v26, %v384_v47  ;;  %v405_v56 = vadd.f32 %v959_v26, %v404_v48 }
  0xba   : > { %v476_v51 = vmax.f32 %v422_v45, 0.0  ;;  %v484_v52 = vmax.f32 %v442_v46, 0.0 }
  0xbb   : > { %v461_v63 = vmax.f32 %v385_v55, 0.0  ;;  %v469_v0 = vmax.f32 %v405_v56, 0.0 }
  0xbc   : > { %v785_v53 = vpack.c.bf16 %v476_v51, %v475_v49  ;;  %v805_v54 = vpack.c.bf16 %v484_v52, %v483_v50 }
  0xbe   : > { %829 = vst [vmem:[%s970_s13 + $0x40] sm:$0xff] %v785_v53  }
  0xbf   : > { %833 = vst [vmem:[%s970_s13 + $0x60] sm:$0xff] %v805_v54   ;;  %v424_v57 = vpop.f32.mrf.mxu2  ;;  %v444_v58 = vpop.f32.mrf.mxu3 }
  0xc0   : > { %v386_v59 = vpop.f32.mrf.mxu0  ;;  %v406_v60 = vpop.f32.mrf.mxu1  ;;  %v425_v5 = vadd.f32 %v959_v26, %v424_v57  ;;  %v445_v6 = vadd.f32 %v959_v26, %v444_v58 }
  0xc1   : > { %v387_v61 = vadd.f32 %v959_v26, %v386_v59  ;;  %v407_v62 = vadd.f32 %v959_v26, %v406_v60 }
  0xc2   : > { %v477_v13 = vmax.f32 %v425_v5, 0.0  ;;  %v485_v14 = vmax.f32 %v445_v6, 0.0 }
  0xc3   : > { %v462_v1 = vmax.f32 %v387_v61, 0.0  ;;  %v470_v2 = vmax.f32 %v407_v62, 0.0 }
  0xc5   : > { %v750_v3 = vpack.c.bf16 %v462_v1, %v461_v63  ;;  %v770_v4 = vpack.c.bf16 %v470_v2, %v469_v0 }
  0xc7   : > { %822 = vst [vmem:[%s970_s13 + $0x8] sm:$0xff] %v750_v3   ;;  %v426_v7 = vpop.f32.mrf.mxu2  ;;  %v446_v8 = vpop.f32.mrf.mxu3 }
  0xc8   : > { %826 = vst [vmem:[%s970_s13 + $0x28] sm:$0xff] %v770_v4   ;;  %v427_v9 = vadd.f32 %v959_v26, %v426_v7  ;;  %v447_v10 = vadd.f32 %v959_v26, %v446_v8  ;;  %v389_v11 = vpop.f32.mrf.mxu0  ;;  %v409_v12 = vpop.f32.mrf.mxu1 }
  0xc9   : > { %v390_v19 = vadd.f32 %v959_v26, %v389_v11  ;;  %v410_v20 = vadd.f32 %v959_v26, %v409_v12 }
  0xca   : > { %v478_v15 = vmax.f32 %v427_v9, 0.0  ;;  %v486_v16 = vmax.f32 %v447_v10, 0.0 }
  0xcb   : > { %v463_v28 = vmax.f32 %v390_v19, 0.0  ;;  %v471_v29 = vmax.f32 %v410_v20, 0.0 }
  0xcc   : > { %v790_v17 = vpack.c.bf16 %v478_v15, %v477_v13  ;;  %v810_v18 = vpack.c.bf16 %v486_v16, %v485_v14 }
  0xce   : > { %830 = vst [vmem:[%s970_s13 + $0x48] sm:$0xff] %v790_v17  }
  0xcf   : > { %834 = vst [vmem:[%s970_s13 + $0x68] sm:$0xff] %v810_v18   ;;  %v429_v21 = vpop.f32.mrf.mxu2  ;;  %v449_v22 = vpop.f32.mrf.mxu3 }
  0xd0   : > { %v391_v23 = vpop.f32.mrf.mxu0  ;;  %v411_v24 = vpop.f32.mrf.mxu1  ;;  %v430_v34 = vadd.f32 %v959_v26, %v429_v21  ;;  %v450_v35 = vadd.f32 %v959_v26, %v449_v22 }
  0xd1   : > { %v392_v25 = vadd.f32 %v959_v26, %v391_v23  ;;  %v412_v27 = vadd.f32 %v959_v26, %v411_v24 }
  0xd2   : > { %v479_v42 = vmax.f32 %v430_v34, 0.0  ;;  %v487_v43 = vmax.f32 %v450_v35, 0.0 }
  0xd3   : > { %v464_v30 = vmax.f32 %v392_v25, 0.0  ;;  %v472_v31 = vmax.f32 %v412_v27, 0.0 }
  0xd5   : > { %v755_v32 = vpack.c.bf16 %v464_v30, %v463_v28  ;;  %v775_v33 = vpack.c.bf16 %v472_v31, %v471_v29 }
  0xd7   : > { %823 = vst [vmem:[%s970_s13 + $0x10] sm:$0xff] %v755_v32   ;;  %v431_v36 = vpop.f32.mrf.mxu2  ;;  %v451_v37 = vpop.f32.mrf.mxu3 }
  0xd8   : > { %827 = vst [vmem:[%s970_s13 + $0x30] sm:$0xff] %v775_v33   ;;  %v432_v38 = vadd.f32 %v959_v26, %v431_v36  ;;  %v452_v39 = vadd.f32 %v959_v26, %v451_v37  ;;  %v394_v40 = vpop.f32.mrf.mxu0  ;;  %v414_v41 = vpop.f32.mrf.mxu1 }
  0xd9   : > { %v395_v48 = vadd.f32 %v959_v26, %v394_v40  ;;  %v415_v49 = vadd.f32 %v959_v26, %v414_v41 }
  0xda   : > { %v480_v44 = vmax.f32 %v432_v38, 0.0  ;;  %v488_v45 = vmax.f32 %v452_v39, 0.0 }
  0xdb   : > { %v465_v56 = vmax.f32 %v395_v48, 0.0  ;;  %v473_v57 = vmax.f32 %v415_v49, 0.0 }
  0xdc   : > { %v795_v46 = vpack.c.bf16 %v480_v44, %v479_v42  ;;  %v815_v47 = vpack.c.bf16 %v488_v45, %v487_v43 }
  0xde   : > { %831 = vst [vmem:[%s970_s13 + $0x50] sm:$0xff] %v795_v46  }
  0xdf   : > { %835 = vst [vmem:[%s970_s13 + $0x70] sm:$0xff] %v815_v47   ;;  %v434_v50 = vpop.f32.mrf.mxu2  ;;  %v454_v51 = vpop.f32.mrf.mxu3 }
  0xe0   : > { %v396_v52 = vpop.f32.mrf.mxu0  ;;  %v416_v53 = vpop.f32.mrf.mxu1  ;;  %v435_v62 = vadd.f32 %v959_v26, %v434_v50  ;;  %v455_v63 = vadd.f32 %v959_v26, %v454_v51 }
  0xe1   : > { %v397_v54 = vadd.f32 %v959_v26, %v396_v52  ;;  %v417_v55 = vadd.f32 %v959_v26, %v416_v53 }
  0xe2   : > { %v481_v4 = vmax.f32 %v435_v62, 0.0  ;;  %v489_v5 = vmax.f32 %v455_v63, 0.0 }
  0xe3   : > { %v466_v58 = vmax.f32 %v397_v54, 0.0  ;;  %v474_v59 = vmax.f32 %v417_v55, 0.0 }
  0xe5   : > { %v760_v60 = vpack.c.bf16 %v466_v58, %v465_v56  ;;  %v780_v61 = vpack.c.bf16 %v474_v59, %v473_v57 }
  0xe7   : > { %824 = vst [vmem:[%s970_s13 + $0x18] sm:$0xff] %v760_v60   ;;  %v436_v0 = vpop.f32.mrf.mxu2  ;;  %v456_v1 = vpop.f32.mrf.mxu3 }
  0xe8   : > { %828 = vst [vmem:[%s970_s13 + $0x38] sm:$0xff] %v780_v61   ;;  %v437_v2 = vadd.f32 %v959_v26, %v436_v0  ;;  %v457_v3 = vadd.f32 %v959_v26, %v456_v1 }
  0xea   : > { %v482_v6 = vmax.f32 %v437_v2, 0.0  ;;  %v490_v7 = vmax.f32 %v457_v3, 0.0 }
  0xec   : > { %v800_v8 = vpack.c.bf16 %v482_v6, %v481_v4  ;;  %v820_v9 = vpack.c.bf16 %v490_v7, %v489_v5 }
  0xee   : > { %832 = vst [vmem:[%s970_s13 + $0x58] sm:$0xff] %v800_v8  }
  0xef   : > { %836 = vst [vmem:[%s970_s13 + $0x78] sm:$0xff] %v820_v9  }
  0xf0 PF: > { %s13_s12 = sadd.s32 1, %s876_s12  }
  0xf1   : > { %p10_p4 = scmp.ge.s32.totalorder %s13_s12, 7  }
  0xf3   :  { %12 = sbr.rel (!%p10_p4) target bundleno = 1 (0x1), region = 62 }

// kernel: net3conv_forward.5
= control target key start
LH: loop header
LB: loop body
LE: loop exit
PB: predicated region body
PF: predicated region fallthrough
CT: control target
= control target key end

     0   :  { %s1435_s1 = inlined_call_operand.vmem [shape: bf16[512,128], index: 1, kind: input, shape index: {}]   ;;  %s1436_s2 = inlined_call_operand.vmem [shape: f32[1,128], index: 2, kind: input, shape index: {}]   ;;  %s1437_s0 = inlined_call_operand.vmem [shape: bf16[128,512], index: 0, kind: input, shape index: {}]   ;;  %s1438_s3 = inlined_call_operand.vmem [shape: bf16[128,128], index: 3, kind: output, shape index: {}]  }
   0x1   :  { %v1009_v0 = vld [vmem:[%s1435_s1 + $0x38] sm:$0xff]  ;;  %v1008_v4 = vld [vmem:[%s1435_s1 + $0x30] sm:$0xff]  ;;  %v1007_v8 = vld [vmem:[%s1435_s1 + $0x28] sm:$0xff] }
   0x2   :  { %v1017_v1 = vld [vmem:[%s1435_s1 + $0x78] sm:$0xff]  ;;  %466 = vmatpush.bf16.msra.mxu0 %v1009_v0  ;;  %v1016_v5 = vld [vmem:[%s1435_s1 + $0x70] sm:$0xff]  ;;  %v1015_v9 = vld [vmem:[%s1435_s1 + $0x68] sm:$0xff] }
   0x3   :  { %v1025_v2 = vld [vmem:[%s1435_s1 + $0xb8] sm:$0xff]  ;;  %515 = vmatpush.bf16.msra.mxu1 %v1017_v1  ;;  %v1024_v6 = vld [vmem:[%s1435_s1 + $0xb0] sm:$0xff]  ;;  %v1023_v10 = vld [vmem:[%s1435_s1 + $0xa8] sm:$0xff] }
   0x4   :  { %v1033_v3 = vld [vmem:[%s1435_s1 + $0xf8] sm:$0xff]  ;;  %564 = vmatpush.bf16.msra.mxu2 %v1025_v2  ;;  %v1032_v7 = vld [vmem:[%s1435_s1 + $0xf0] sm:$0xff]  ;;  %v1031_v11 = vld [vmem:[%s1435_s1 + $0xe8] sm:$0xff] }
   0x5   :  { %613 = vmatpush.bf16.msra.mxu3 %v1033_v3  ;;  %v1006_v12 = vld [vmem:[%s1435_s1 + $0x20] sm:$0xff]  ;;  %v1005_v16 = vld [vmem:[%s1435_s1 + $0x18] sm:$0xff]  ;;  %v1004_v20 = vld [vmem:[%s1435_s1 + $0x10] sm:$0xff] }
   0x6   :  { %467 = vmatpush.bf16.msra.mxu0 %v1008_v4  ;;  %v1014_v13 = vld [vmem:[%s1435_s1 + $0x60] sm:$0xff]  ;;  %v1013_v17 = vld [vmem:[%s1435_s1 + $0x58] sm:$0xff]  ;;  %v1012_v21 = vld [vmem:[%s1435_s1 + $0x50] sm:$0xff] }
   0x7   :  { %516 = vmatpush.bf16.msra.mxu1 %v1016_v5  ;;  %v1022_v14 = vld [vmem:[%s1435_s1 + $0xa0] sm:$0xff]  ;;  %v1021_v18 = vld [vmem:[%s1435_s1 + $0x98] sm:$0xff]  ;;  %v1020_v22 = vld [vmem:[%s1435_s1 + $0x90] sm:$0xff] }
   0x8   :  { %565 = vmatpush.bf16.msra.mxu2 %v1024_v6  ;;  %v1030_v15 = vld [vmem:[%s1435_s1 + $0xe0] sm:$0xff]  ;;  %v1029_v19 = vld [vmem:[%s1435_s1 + $0xd8] sm:$0xff]  ;;  %v1028_v23 = vld [vmem:[%s1435_s1 + $0xd0] sm:$0xff] }
   0x9   :  { %614 = vmatpush.bf16.msra.mxu3 %v1032_v7  ;;  %v1003_v24 = vld [vmem:[%s1435_s1 + $0x8] sm:$0xff]  ;;  %v1002_v28 = vld [vmem:[%s1435_s1] sm:$0xff]  ;;  %v972_v33 = vld [vmem:[%s1437_s0 + $0xc] sm:$0xf0] }
   0xa   :  { %468 = vmatpush.bf16.msra.mxu0 %v1007_v8  ;;  %v1011_v25 = vld [vmem:[%s1435_s1 + $0x48] sm:$0xff]  ;;  %v1010_v29 = vld [vmem:[%s1435_s1 + $0x40] sm:$0xff]  ;;  %v718_v35 = vld [vmem:[%s1437_s0 + $0x10] sm:$0xf0] }
   0xb   :  { %517 = vmatpush.bf16.msra.mxu1 %v1015_v9  ;;  %v1019_v26 = vld [vmem:[%s1435_s1 + $0x88] sm:$0xff]  ;;  %v1018_v30 = vld [vmem:[%s1435_s1 + $0x80] sm:$0xff]  ;;  %v973_v37 = vld [vmem:[%s1437_s0 + $0x14] sm:$0xf0] }
   0xc   :  { %566 = vmatpush.bf16.msra.mxu2 %v1023_v10  ;;  %v1027_v27 = vld [vmem:[%s1435_s1 + $0xc8] sm:$0xff]  ;;  %v1026_v31 = vld [vmem:[%s1435_s1 + $0xc0] sm:$0xff]  ;;  %v726_v39 = vld [vmem:[%s1437_s0 + $0x18] sm:$0xf0] }
   0xd   :  { %615 = vmatpush.bf16.msra.mxu3 %v1031_v11  ;;  %v716_v32 = vld [vmem:[%s1437_s0] sm:$0xf]  ;;  %v970_v34 = vld [vmem:[%s1437_s0 + $0x4] sm:$0xf]  ;;  %v724_v36 = vld [vmem:[%s1437_s0 + $0x8] sm:$0xf] }
   0xe   :  { %469 = vmatpush.bf16.msra.mxu0 %v1006_v12  ;;  %v971_v38 = vld [vmem:[%s1437_s0 + $0xc] sm:$0xf]  ;;  %v717_v40 = vor.u32 %v972_v33, %v716_v32  ;;  %v721_v41 = vor.u32 %v970_v34, %v718_v35  ;;  %v725_v42 = vor.u32 %v973_v37, %v724_v36  ;;  %v732_v44 = vld [vmem:[%s1437_s0 + $0x20] sm:$0xf]  ;;  %v976_v45 = vld [vmem:[%s1437_s0 + $0x2c] sm:$0xf0] }
   0xf   :  { %518 = vmatpush.bf16.msra.mxu1 %v1014_v13  ;;  %v729_v43 = vor.u32 %v971_v38, %v726_v39  ;;  %v974_v46 = vld [vmem:[%s1437_s0 + $0x24] sm:$0xf]  ;;  %v734_v47 = vld [vmem:[%s1437_s0 + $0x30] sm:$0xf0]  ;;  %v740_v48 = vld [vmem:[%s1437_s0 + $0x28] sm:$0xf]  ;;  %v733_v52 = vor.u32 %v976_v45, %v732_v44 }
  0x10   :  { %567 = vmatpush.bf16.msra.mxu2 %v1022_v14  ;;  %v977_v49 = vld [vmem:[%s1437_s0 + $0x34] sm:$0xf0]  ;;  %v975_v50 = vld [vmem:[%s1437_s0 + $0x2c] sm:$0xf]  ;;  %v742_v51 = vld [vmem:[%s1437_s0 + $0x38] sm:$0xf0]  ;;  %v737_v53 = vor.u32 %v974_v46, %v734_v47 }
  0x11   :  { %616 = vmatpush.bf16.msra.mxu3 %v1030_v15  ;;  %v741_v54 = vor.u32 %v977_v49, %v740_v48  ;;  %v745_v55 = vor.u32 %v975_v50, %v742_v51  ;;  %v748_v56 = vld [vmem:[%s1437_s0 + $0x40] sm:$0xf]  ;;  %v980_v57 = vld [vmem:[%s1437_s0 + $0x4c] sm:$0xf0]  ;;  %v978_v58 = vld [vmem:[%s1437_s0 + $0x44] sm:$0xf] }
  0x12   :  { %470 = vmatpush.bf16.msra.mxu0 %v1005_v16  ;;  %v750_v59 = vld [vmem:[%s1437_s0 + $0x50] sm:$0xf0]  ;;  %v756_v60 = vld [vmem:[%s1437_s0 + $0x48] sm:$0xf]  ;;  %v981_v61 = vld [vmem:[%s1437_s0 + $0x54] sm:$0xf0]  ;;  %v749_v0 = vor.u32 %v980_v57, %v748_v56 }
  0x13   :  { %519 = vmatpush.bf16.msra.mxu1 %v1013_v17  ;;  %v979_v62 = vld [vmem:[%s1437_s0 + $0x4c] sm:$0xf]  ;;  %v758_v63 = vld [vmem:[%s1437_s0 + $0x58] sm:$0xf0]  ;;  %v753_v1 = vor.u32 %v978_v58, %v750_v59  ;;  %v757_v2 = vor.u32 %v981_v61, %v756_v60  ;;  %v764_v4 = vld [vmem:[%s1437_s0 + $0x60] sm:$0xf] }
  0x14   :  { %568 = vmatpush.bf16.msra.mxu2 %v1021_v18  ;;  %v761_v3 = vor.u32 %v979_v62, %v758_v63  ;;  %v984_v5 = vld [vmem:[%s1437_s0 + $0x6c] sm:$0xf0]  ;;  %v982_v6 = vld [vmem:[%s1437_s0 + $0x64] sm:$0xf]  ;;  %v766_v7 = vld [vmem:[%s1437_s0 + $0x70] sm:$0xf0] }
  0x15   :  { %617 = vmatpush.bf16.msra.mxu3 %v1029_v19  ;;  %v772_v8 = vld [vmem:[%s1437_s0 + $0x68] sm:$0xf]  ;;  %v985_v9 = vld [vmem:[%s1437_s0 + $0x74] sm:$0xf0]  ;;  %v983_v10 = vld [vmem:[%s1437_s0 + $0x6c] sm:$0xf]  ;;  %v765_v12 = vor.u32 %v984_v5, %v764_v4  ;;  %v769_v13 = vor.u32 %v982_v6, %v766_v7 }
  0x16   :  { %471 = vmatpush.bf16.msra.mxu0 %v1004_v20  ;;  %v774_v11 = vld [vmem:[%s1437_s0 + $0x78] sm:$0xf0]  ;;  %v773_v14 = vor.u32 %v985_v9, %v772_v8  ;;  %v780_v16 = vld [vmem:[%s1437_s0 + $0x80] sm:$0xf]  ;;  %v988_v17 = vld [vmem:[%s1437_s0 + $0x8c] sm:$0xf0] }
  0x17   :  { %520 = vmatpush.bf16.msra.mxu1 %v1012_v21  ;;  %v777_v15 = vor.u32 %v983_v10, %v774_v11  ;;  %v986_v18 = vld [vmem:[%s1437_s0 + $0x84] sm:$0xf]  ;;  %v782_v19 = vld [vmem:[%s1437_s0 + $0x90] sm:$0xf0]  ;;  %v788_v20 = vld [vmem:[%s1437_s0 + $0x88] sm:$0xf] }
  0x18   :  { %569 = vmatpush.bf16.msra.mxu2 %v1020_v22  ;;  %v989_v21 = vld [vmem:[%s1437_s0 + $0x94] sm:$0xf0]  ;;  %v987_v22 = vld [vmem:[%s1437_s0 + $0x8c] sm:$0xf]  ;;  %v804_v32 = vld [vmem:[%s1437_s0 + $0xa8] sm:$0xf] }
  0x19   :  { %618 = vmatpush.bf16.msra.mxu3 %v1028_v23  ;;  %v790_v23 = vld [vmem:[%s1437_s0 + $0x98] sm:$0xf0]  ;;  %v993_v33 = vld [vmem:[%s1437_s0 + $0xb4] sm:$0xf0]  ;;  %v991_v34 = vld [vmem:[%s1437_s0 + $0xac] sm:$0xf] }
  0x1a   :  { %472 = vmatpush.bf16.msra.mxu0 %v1003_v24  ;;  %v781_v24 = vor.u32 %v988_v17, %v780_v16  ;;  %v806_v35 = vld [vmem:[%s1437_s0 + $0xb8] sm:$0xf0]  ;;  %v805_v38 = vor.u32 %v993_v33, %v804_v32  ;;  %v820_v44 = vld [vmem:[%s1437_s0 + $0xc8] sm:$0xf]  ;;  %v997_v45 = vld [vmem:[%s1437_s0 + $0xd4] sm:$0xf0] }
  0x1b   :  { %521 = vmatpush.bf16.msra.mxu1 %v1011_v25  ;;  %v785_v25 = vor.u32 %v986_v18, %v782_v19  ;;  %v809_v39 = vor.u32 %v991_v34, %v806_v35  ;;  %v995_v46 = vld [vmem:[%s1437_s0 + $0xcc] sm:$0xf]  ;;  %v822_v47 = vld [vmem:[%s1437_s0 + $0xd8] sm:$0xf0]  ;;  %v821_v50 = vor.u32 %v997_v45, %v820_v44  ;;  %v836_v56 = vld [vmem:[%s1437_s0 + $0xe8] sm:$0xf] }
  0x1c   :  { %570 = vmatpush.bf16.msra.mxu2 %v1019_v26  ;;  %v789_v26 = vor.u32 %v989_v21, %v788_v20  ;;  %v825_v51 = vor.u32 %v995_v46, %v822_v47  ;;  %v1001_v57 = vld [vmem:[%s1437_s0 + $0xf4] sm:$0xf0]  ;;  %v999_v58 = vld [vmem:[%s1437_s0 + $0xec] sm:$0xf]  ;;  %v838_v59 = vld [vmem:[%s1437_s0 + $0xf8] sm:$0xf0] }
  0x1d   :  { %619 = vmatpush.bf16.msra.mxu3 %v1027_v27  ;;  %v793_v27 = vor.u32 %v987_v22, %v790_v23  ;;  %v837_v62 = vor.u32 %v1001_v57, %v836_v56  ;;  %v841_v63 = vor.u32 %v999_v58, %v838_v59 }
  0x1e   :  { %473 = vmatpush.bf16.msra.mxu0 %v1002_v28  ;;  %v796_v28 = vld [vmem:[%s1437_s0 + $0xa0] sm:$0xf] }
  0x1f   :  { %522 = vmatpush.bf16.msra.mxu1 %v1010_v29  ;;  %v992_v29 = vld [vmem:[%s1437_s0 + $0xac] sm:$0xf0] }
  0x20   :  { %571 = vmatpush.bf16.msra.mxu2 %v1018_v30  ;;  %v990_v30 = vld [vmem:[%s1437_s0 + $0xa4] sm:$0xf]  ;;  %v797_v36 = vor.u32 %v992_v29, %v796_v28 }
  0x21   :  { %620 = vmatpush.bf16.msra.mxu3 %v1026_v31  ;;  %474 = vmatmul.bf16.vlgmr.msra.gmra.mxu0 %v717_v40  ;;  %v798_v31 = vld [vmem:[%s1437_s0 + $0xb0] sm:$0xf0]  ;;  %v812_v40 = vld [vmem:[%s1437_s0 + $0xc0] sm:$0xf] }
  0x22   :  { %523 = vmatmul.bf16.vlgmr.msra.gmra.mxu1 %v721_v41  ;;  %v801_v37 = vor.u32 %v990_v30, %v798_v31  ;;  %v996_v41 = vld [vmem:[%s1437_s0 + $0xcc] sm:$0xf0] }
  0x23   :  { %572 = vmatmul.bf16.vlgmr.msra.gmra.mxu2 %v725_v42  ;;  %v994_v42 = vld [vmem:[%s1437_s0 + $0xc4] sm:$0xf]  ;;  %v813_v48 = vor.u32 %v996_v41, %v812_v40 }
  0x24   :  { %621 = vmatmul.bf16.vlgmr.msra.gmra.mxu3 %v729_v43  ;;  %v814_v43 = vld [vmem:[%s1437_s0 + $0xd0] sm:$0xf0] }
  0x25   :  { %v817_v49 = vor.u32 %v994_v42, %v814_v43 }
  0x31   :  { %479 = vmatmul.bf16.gmra.mxu0 %v733_v52  ;;  %v828_v52 = vld [vmem:[%s1437_s0 + $0xe0] sm:$0xf] }
  0x32   :  { %528 = vmatmul.bf16.gmra.mxu1 %v737_v53  ;;  %v1000_v53 = vld [vmem:[%s1437_s0 + $0xec] sm:$0xf0] }
  0x33   :  { %577 = vmatmul.bf16.gmra.mxu2 %v741_v54  ;;  %v998_v54 = vld [vmem:[%s1437_s0 + $0xe4] sm:$0xf]  ;;  %v829_v60 = vor.u32 %v1000_v53, %v828_v52 }
  0x34   :  { %626 = vmatmul.bf16.gmra.mxu3 %v745_v55  ;;  %v830_v55 = vld [vmem:[%s1437_s0 + $0xf0] sm:$0xf0] }
  0x35   :  { %v833_v61 = vor.u32 %v998_v54, %v830_v55 }
  0x41   :  { %484 = vmatmul.bf16.gmra.mxu0 %v749_v0  ;;  %v1393_v0 = vld [vmem:[%s1436_s2] ss:$0 sm:$0xff] }
  0x42   :  { %533 = vmatmul.bf16.gmra.mxu1 %v753_v1 }
  0x43   :  { %582 = vmatmul.bf16.gmra.mxu2 %v757_v2 }
  0x44   :  { %631 = vmatmul.bf16.gmra.mxu3 %v761_v3 }
  0x51   :  { %489 = vmatmul.bf16.gmra.mxu0 %v765_v12 }
  0x52   :  { %538 = vmatmul.bf16.gmra.mxu1 %v769_v13 }
  0x53   :  { %587 = vmatmul.bf16.gmra.mxu2 %v773_v14 }
  0x54   :  { %636 = vmatmul.bf16.gmra.mxu3 %v777_v15 }
  0x61   :  { %494 = vmatmul.bf16.gmra.mxu0 %v781_v24 }
  0x62   :  { %543 = vmatmul.bf16.gmra.mxu1 %v785_v25 }
  0x63   :  { %592 = vmatmul.bf16.gmra.mxu2 %v789_v26 }
  0x64   :  { %641 = vmatmul.bf16.gmra.mxu3 %v793_v27 }
  0x71   :  { %499 = vmatmul.bf16.gmra.mxu0 %v797_v36 }
  0x72   :  { %548 = vmatmul.bf16.gmra.mxu1 %v801_v37 }
  0x73   :  { %597 = vmatmul.bf16.gmra.mxu2 %v805_v38 }
  0x74   :  { %646 = vmatmul.bf16.gmra.mxu3 %v809_v39 }
  0x81   :  { %504 = vmatmul.bf16.gmra.mxu0 %v813_v48 }
  0x82   :  { %553 = vmatmul.bf16.gmra.mxu1 %v817_v49 }
  0x83   :  { %602 = vmatmul.bf16.gmra.mxu2 %v821_v50 }
  0x84   :  { %651 = vmatmul.bf16.gmra.mxu3 %v825_v51 }
  0x91   :  { %509 = vmatmul.bf16.gmra.mxu0 %v829_v60 }
  0x92   :  { %558 = vmatmul.bf16.gmra.mxu1 %v833_v61 }
  0x93   :  { %607 = vmatmul.bf16.gmra.mxu2 %v837_v62 }
  0x94   :  { %656 = vmatmul.bf16.gmra.mxu3 %v841_v63 }
  0x9e   :  { %v475_v1 = vpop.f32.mrf.mxu0 }
  0x9f   :  { %v524_v2 = vpop.f32.mrf.mxu1  ;;  %v476_v3 = vadd.f32 %v1393_v0, %v475_v1 }
  0xa1   :  { %v525_v6 = vadd.f32 %v524_v2, %v476_v3 }
  0xa6   :  { %v573_v4 = vpop.f32.mrf.mxu2  ;;  %v477_v7 = vpop.f32.mrf.mxu0 }
  0xa7   :  { %v622_v5 = vpop.f32.mrf.mxu3  ;;  %v526_v8 = vpop.f32.mrf.mxu1  ;;  %v478_v9 = vadd.f32 %v1393_v0, %v477_v7  ;;  %v574_v10 = vadd.f32 %v573_v4, %v525_v6 }
  0xa9   :  { %v527_v11 = vadd.f32 %v526_v8, %v478_v9  ;;  %v623_v14 = vadd.f32 %v622_v5, %v574_v10 }
  0xab   :  { %v662_v19 = vmax.f32 %v623_v14, 0.0 }
  0xae   :  { %v575_v12 = vpop.f32.mrf.mxu2  ;;  %v480_v16 = vpop.f32.mrf.mxu0 }
  0xaf   :  { %v624_v13 = vpop.f32.mrf.mxu3  ;;  %v576_v15 = vadd.f32 %v575_v12, %v527_v11  ;;  %v529_v17 = vpop.f32.mrf.mxu1  ;;  %v481_v21 = vadd.f32 %v1393_v0, %v480_v16 }
  0xb1   :  { %v625_v18 = vadd.f32 %v624_v13, %v576_v15  ;;  %v530_v25 = vadd.f32 %v529_v17, %v481_v21 }
  0xb3   :  { %v663_v20 = vmax.f32 %v625_v18, 0.0 }
  0xb5   :  { %v1037_v22 = vpack.c.bf16 %v663_v20, %v662_v19 }
  0xb6   :  { %v578_v23 = vpop.f32.mrf.mxu2  ;;  %v482_v26 = vpop.f32.mrf.mxu0 }
  0xb7   :  { %v627_v24 = vpop.f32.mrf.mxu3  ;;  %1038 = vst [vmem:[%s1438_s3] sm:$0xff] %v1037_v22   ;;  %v531_v27 = vpop.f32.mrf.mxu1  ;;  %v483_v28 = vadd.f32 %v1393_v0, %v482_v26  ;;  %v579_v29 = vadd.f32 %v578_v23, %v530_v25 }
  0xb9   :  { %v532_v30 = vadd.f32 %v531_v27, %v483_v28  ;;  %v628_v33 = vadd.f32 %v627_v24, %v579_v29 }
  0xbb   :  { %v664_v38 = vmax.f32 %v628_v33, 0.0 }
  0xbe   :  { %v580_v31 = vpop.f32.mrf.mxu2  ;;  %v485_v35 = vpop.f32.mrf.mxu0 }
  0xbf   :  { %v629_v32 = vpop.f32.mrf.mxu3  ;;  %v581_v34 = vadd.f32 %v580_v31, %v532_v30  ;;  %v534_v36 = vpop.f32.mrf.mxu1  ;;  %v486_v40 = vadd.f32 %v1393_v0, %v485_v35 }
  0xc1   :  { %v630_v37 = vadd.f32 %v629_v32, %v581_v34  ;;  %v535_v44 = vadd.f32 %v534_v36, %v486_v40 }
  0xc3   :  { %v665_v39 = vmax.f32 %v630_v37, 0.0 }
  0xc5   :  { %v1042_v41 = vpack.c.bf16 %v665_v39, %v664_v38 }
  0xc6   :  { %v583_v42 = vpop.f32.mrf.mxu2  ;;  %v487_v45 = vpop.f32.mrf.mxu0 }
  0xc7   :  { %v632_v43 = vpop.f32.mrf.mxu3  ;;  %1074 = vst [vmem:[%s1438_s3 + $0x8] sm:$0xff] %v1042_v41   ;;  %v536_v46 = vpop.f32.mrf.mxu1  ;;  %v488_v47 = vadd.f32 %v1393_v0, %v487_v45  ;;  %v584_v48 = vadd.f32 %v583_v42, %v535_v44 }
  0xc9   :  { %v537_v49 = vadd.f32 %v536_v46, %v488_v47  ;;  %v633_v52 = vadd.f32 %v632_v43, %v584_v48 }
  0xcb   :  { %v666_v57 = vmax.f32 %v633_v52, 0.0 }
  0xce   :  { %v585_v50 = vpop.f32.mrf.mxu2  ;;  %v490_v54 = vpop.f32.mrf.mxu0 }
  0xcf   :  { %v634_v51 = vpop.f32.mrf.mxu3  ;;  %v586_v53 = vadd.f32 %v585_v50, %v537_v49  ;;  %v539_v55 = vpop.f32.mrf.mxu1  ;;  %v491_v59 = vadd.f32 %v1393_v0, %v490_v54 }
  0xd1   :  { %v635_v56 = vadd.f32 %v634_v51, %v586_v53  ;;  %v540_v63 = vadd.f32 %v539_v55, %v491_v59 }
  0xd3   :  { %v667_v58 = vmax.f32 %v635_v56, 0.0 }
  0xd5   :  { %v1047_v60 = vpack.c.bf16 %v667_v58, %v666_v57 }
  0xd6   :  { %v588_v61 = vpop.f32.mrf.mxu2  ;;  %v492_v1 = vpop.f32.mrf.mxu0 }
  0xd7   :  { %v637_v62 = vpop.f32.mrf.mxu3  ;;  %1075 = vst [vmem:[%s1438_s3 + $0x10] sm:$0xff] %v1047_v60   ;;  %v541_v2 = vpop.f32.mrf.mxu1  ;;  %v493_v3 = vadd.f32 %v1393_v0, %v492_v1  ;;  %v589_v4 = vadd.f32 %v588_v61, %v540_v63 }
  0xd9   :  { %v542_v5 = vadd.f32 %v541_v2, %v493_v3  ;;  %v638_v8 = vadd.f32 %v637_v62, %v589_v4 }
  0xdb   :  { %v668_v13 = vmax.f32 %v638_v8, 0.0 }
  0xde   :  { %v590_v6 = vpop.f32.mrf.mxu2  ;;  %v495_v10 = vpop.f32.mrf.mxu0 }
  0xdf   :  { %v639_v7 = vpop.f32.mrf.mxu3  ;;  %v591_v9 = vadd.f32 %v590_v6, %v542_v5  ;;  %v544_v11 = vpop.f32.mrf.mxu1  ;;  %v496_v15 = vadd.f32 %v1393_v0, %v495_v10 }
  0xe1   :  { %v640_v12 = vadd.f32 %v639_v7, %v591_v9  ;;  %v545_v19 = vadd.f32 %v544_v11, %v496_v15 }
  0xe3   :  { %v669_v14 = vmax.f32 %v640_v12, 0.0 }
  0xe5   :  { %v1052_v16 = vpack.c.bf16 %v669_v14, %v668_v13 }
  0xe6   :  { %v593_v17 = vpop.f32.mrf.mxu2  ;;  %v497_v20 = vpop.f32.mrf.mxu0 }
  0xe7   :  { %v642_v18 = vpop.f32.mrf.mxu3  ;;  %1076 = vst [vmem:[%s1438_s3 + $0x18] sm:$0xff] %v1052_v16   ;;  %v546_v21 = vpop.f32.mrf.mxu1  ;;  %v498_v22 = vadd.f32 %v1393_v0, %v497_v20  ;;  %v594_v23 = vadd.f32 %v593_v17, %v545_v19 }
  0xe9   :  { %v547_v24 = vadd.f32 %v546_v21, %v498_v22  ;;  %v643_v27 = vadd.f32 %v642_v18, %v594_v23 }
  0xeb   :  { %v670_v32 = vmax.f32 %v643_v27, 0.0 }
  0xee   :  { %v595_v25 = vpop.f32.mrf.mxu2  ;;  %v500_v29 = vpop.f32.mrf.mxu0 }
  0xef   :  { %v644_v26 = vpop.f32.mrf.mxu3  ;;  %v596_v28 = vadd.f32 %v595_v25, %v547_v24  ;;  %v549_v30 = vpop.f32.mrf.mxu1  ;;  %v501_v34 = vadd.f32 %v1393_v0, %v500_v29 }
  0xf1   :  { %v645_v31 = vadd.f32 %v644_v26, %v596_v28  ;;  %v550_v38 = vadd.f32 %v549_v30, %v501_v34 }
  0xf3   :  { %v671_v33 = vmax.f32 %v645_v31, 0.0 }
  0xf5   :  { %v1057_v35 = vpack.c.bf16 %v671_v33, %v670_v32 }
  0xf6   :  { %v598_v36 = vpop.f32.mrf.mxu2  ;;  %v502_v39 = vpop.f32.mrf.mxu0 }
  0xf7   :  { %v647_v37 = vpop.f32.mrf.mxu3  ;;  %1077 = vst [vmem:[%s1438_s3 + $0x20] sm:$0xff] %v1057_v35   ;;  %v551_v40 = vpop.f32.mrf.mxu1  ;;  %v503_v41 = vadd.f32 %v1393_v0, %v502_v39  ;;  %v599_v42 = vadd.f32 %v598_v36, %v550_v38 }
  0xf9   :  { %v552_v43 = vadd.f32 %v551_v40, %v503_v41  ;;  %v648_v46 = vadd.f32 %v647_v37, %v599_v42 }
  0xfb   :  { %v672_v51 = vmax.f32 %v648_v46, 0.0 }
  0xfe   :  { %v600_v44 = vpop.f32.mrf.mxu2  ;;  %v505_v48 = vpop.f32.mrf.mxu0 }
  0xff   :  { %v649_v45 = vpop.f32.mrf.mxu3  ;;  %v601_v47 = vadd.f32 %v600_v44, %v552_v43  ;;  %v554_v49 = vpop.f32.mrf.mxu1  ;;  %v506_v53 = vadd.f32 %v1393_v0, %v505_v48 }
 0x101   :  { %v650_v50 = vadd.f32 %v649_v45, %v601_v47  ;;  %v555_v57 = vadd.f32 %v554_v49, %v506_v53 }
 0x103   :  { %v673_v52 = vmax.f32 %v650_v50, 0.0 }
 0x105   :  { %v1062_v54 = vpack.c.bf16 %v673_v52, %v672_v51 }
 0x106   :  { %v603_v55 = vpop.f32.mrf.mxu2  ;;  %v507_v58 = vpop.f32.mrf.mxu0 }
 0x107   :  { %v652_v56 = vpop.f32.mrf.mxu3  ;;  %1078 = vst [vmem:[%s1438_s3 + $0x28] sm:$0xff] %v1062_v54   ;;  %v556_v59 = vpop.f32.mrf.mxu1  ;;  %v508_v60 = vadd.f32 %v1393_v0, %v507_v58  ;;  %v604_v61 = vadd.f32 %v603_v55, %v555_v57 }
 0x109   :  { %v557_v62 = vadd.f32 %v556_v59, %v508_v60  ;;  %v653_v2 = vadd.f32 %v652_v56, %v604_v61 }
 0x10b   :  { %v674_v7 = vmax.f32 %v653_v2, 0.0 }
 0x10e   :  { %v605_v63 = vpop.f32.mrf.mxu2  ;;  %v510_v4 = vpop.f32.mrf.mxu0 }
 0x10f   :  { %v654_v1 = vpop.f32.mrf.mxu3  ;;  %v606_v3 = vadd.f32 %v605_v63, %v557_v62  ;;  %v559_v6 = vpop.f32.mrf.mxu1  ;;  %v511_v9 = vadd.f32 %v1393_v0, %v510_v4 }
 0x111   :  { %v655_v5 = vadd.f32 %v654_v1, %v606_v3  ;;  %v560_v13 = vadd.f32 %v559_v6, %v511_v9 }
 0x113   :  { %v675_v8 = vmax.f32 %v655_v5, 0.0 }
 0x115   :  { %v1067_v10 = vpack.c.bf16 %v675_v8, %v674_v7 }
 0x116   :  { %v608_v11 = vpop.f32.mrf.mxu2  ;;  %v512_v14 = vpop.f32.mrf.mxu0 }
 0x117   :  { %v657_v12 = vpop.f32.mrf.mxu3  ;;  %1079 = vst [vmem:[%s1438_s3 + $0x30] sm:$0xff] %v1067_v10   ;;  %v513_v15 = vadd.f32 %v1393_v0, %v512_v14  ;;  %v609_v16 = vadd.f32 %v608_v11, %v560_v13  ;;  %v561_v17 = vpop.f32.mrf.mxu1 }
 0x119   :  { %v562_v18 = vadd.f32 %v561_v17, %v513_v15  ;;  %v658_v20 = vadd.f32 %v657_v12, %v609_v16 }
 0x11b   :  { %v676_v24 = vmax.f32 %v658_v20, 0.0 }
 0x11e   :  { %v610_v19 = vpop.f32.mrf.mxu2 }
 0x11f   :  { %v611_v21 = vadd.f32 %v610_v19, %v562_v18  ;;  %v659_v22 = vpop.f32.mrf.mxu3 }
 0x121   :  { %v660_v23 = vadd.f32 %v659_v22, %v611_v21 }
 0x123   :  { %v677_v25 = vmax.f32 %v660_v23, 0.0 }
 0x125   :  { %v1072_v26 = vpack.c.bf16 %v677_v25, %v676_v24 }
 0x127   :  { %1080 = vst [vmem:[%s1438_s3 + $0x38] sm:$0xff] %v1072_v26  }

// kernel: net3conv_forward.6
= control target key start
LH: loop header
LB: loop body
LE: loop exit
PB: predicated region body
PF: predicated region fallthrough
CT: control target
= control target key end

     0   :  { %s799_s1 = inlined_call_operand.vmem [shape: bf16[512,128], index: 1, kind: input, shape index: {}]   ;;  %s800_s2 = inlined_call_operand.vmem [shape: f32[1,128], index: 2, kind: input, shape index: {}]   ;;  %s801_s0 = inlined_call_operand.vmem [shape: bf16[32,512], index: 0, kind: input, shape index: {}]   ;;  %s802_s3 = inlined_call_operand.vmem [shape: bf16[32,128], index: 3, kind: output, shape index: {}]  }
   0x1   :  { %v589_v0 = vld [vmem:[%s799_s1 + $0x38] sm:$0xff]  ;;  %v588_v4 = vld [vmem:[%s799_s1 + $0x30] sm:$0xff]  ;;  %v587_v8 = vld [vmem:[%s799_s1 + $0x28] sm:$0xff] }
   0x2   :  { %v597_v1 = vld [vmem:[%s799_s1 + $0x78] sm:$0xff]  ;;  %322 = vmatpush.bf16.msra.mxu0 %v589_v0  ;;  %v596_v5 = vld [vmem:[%s799_s1 + $0x70] sm:$0xff]  ;;  %v595_v9 = vld [vmem:[%s799_s1 + $0x68] sm:$0xff] }
   0x3   :  { %v605_v2 = vld [vmem:[%s799_s1 + $0xb8] sm:$0xff]  ;;  %341 = vmatpush.bf16.msra.mxu1 %v597_v1  ;;  %v604_v6 = vld [vmem:[%s799_s1 + $0xb0] sm:$0xff]  ;;  %v603_v10 = vld [vmem:[%s799_s1 + $0xa8] sm:$0xff] }
   0x4   :  { %v613_v3 = vld [vmem:[%s799_s1 + $0xf8] sm:$0xff]  ;;  %360 = vmatpush.bf16.msra.mxu2 %v605_v2  ;;  %v612_v7 = vld [vmem:[%s799_s1 + $0xf0] sm:$0xff]  ;;  %v611_v11 = vld [vmem:[%s799_s1 + $0xe8] sm:$0xff] }
   0x5   :  { %379 = vmatpush.bf16.msra.mxu3 %v613_v3  ;;  %v586_v12 = vld [vmem:[%s799_s1 + $0x20] sm:$0xff]  ;;  %v585_v16 = vld [vmem:[%s799_s1 + $0x18] sm:$0xff]  ;;  %v584_v20 = vld [vmem:[%s799_s1 + $0x10] sm:$0xff] }
   0x6   :  { %323 = vmatpush.bf16.msra.mxu0 %v588_v4  ;;  %v594_v13 = vld [vmem:[%s799_s1 + $0x60] sm:$0xff]  ;;  %v593_v17 = vld [vmem:[%s799_s1 + $0x58] sm:$0xff]  ;;  %v592_v21 = vld [vmem:[%s799_s1 + $0x50] sm:$0xff] }
   0x7   :  { %342 = vmatpush.bf16.msra.mxu1 %v596_v5  ;;  %v602_v14 = vld [vmem:[%s799_s1 + $0xa0] sm:$0xff]  ;;  %v601_v18 = vld [vmem:[%s799_s1 + $0x98] sm:$0xff]  ;;  %v600_v22 = vld [vmem:[%s799_s1 + $0x90] sm:$0xff] }
   0x8   :  { %361 = vmatpush.bf16.msra.mxu2 %v604_v6  ;;  %v610_v15 = vld [vmem:[%s799_s1 + $0xe0] sm:$0xff]  ;;  %v609_v19 = vld [vmem:[%s799_s1 + $0xd8] sm:$0xff]  ;;  %v608_v23 = vld [vmem:[%s799_s1 + $0xd0] sm:$0xff] }
   0x9   :  { %380 = vmatpush.bf16.msra.mxu3 %v612_v7  ;;  %v583_v24 = vld [vmem:[%s799_s1 + $0x8] sm:$0xff]  ;;  %v582_v28 = vld [vmem:[%s799_s1] sm:$0xff]  ;;  %v576_v33 = vld [vmem:[%s801_s0 + $0xc] sm:$0xf0] }
   0xa   :  { %324 = vmatpush.bf16.msra.mxu0 %v587_v8  ;;  %v591_v25 = vld [vmem:[%s799_s1 + $0x48] sm:$0xff]  ;;  %v590_v29 = vld [vmem:[%s799_s1 + $0x40] sm:$0xff]  ;;  %v418_v35 = vld [vmem:[%s801_s0 + $0x10] sm:$0xf0] }
   0xb   :  { %343 = vmatpush.bf16.msra.mxu1 %v595_v9  ;;  %v599_v26 = vld [vmem:[%s799_s1 + $0x88] sm:$0xff]  ;;  %v598_v30 = vld [vmem:[%s799_s1 + $0x80] sm:$0xff]  ;;  %v577_v37 = vld [vmem:[%s801_s0 + $0x14] sm:$0xf0] }
   0xc   :  { %362 = vmatpush.bf16.msra.mxu2 %v603_v10  ;;  %v607_v27 = vld [vmem:[%s799_s1 + $0xc8] sm:$0xff]  ;;  %v606_v31 = vld [vmem:[%s799_s1 + $0xc0] sm:$0xff]  ;;  %v426_v39 = vld [vmem:[%s801_s0 + $0x18] sm:$0xf0] }
   0xd   :  { %381 = vmatpush.bf16.msra.mxu3 %v611_v11  ;;  %v416_v32 = vld [vmem:[%s801_s0] sm:$0xf]  ;;  %v574_v34 = vld [vmem:[%s801_s0 + $0x4] sm:$0xf]  ;;  %v424_v36 = vld [vmem:[%s801_s0 + $0x8] sm:$0xf] }
   0xe   :  { %325 = vmatpush.bf16.msra.mxu0 %v586_v12  ;;  %v575_v38 = vld [vmem:[%s801_s0 + $0xc] sm:$0xf]  ;;  %v417_v40 = vor.u32 %v576_v33, %v416_v32  ;;  %v421_v41 = vor.u32 %v574_v34, %v418_v35  ;;  %v425_v42 = vor.u32 %v577_v37, %v424_v36  ;;  %v432_v44 = vld [vmem:[%s801_s0 + $0x20] sm:$0xf]  ;;  %v580_v45 = vld [vmem:[%s801_s0 + $0x2c] sm:$0xf0] }
   0xf   :  { %344 = vmatpush.bf16.msra.mxu1 %v594_v13  ;;  %v429_v43 = vor.u32 %v575_v38, %v426_v39  ;;  %v578_v46 = vld [vmem:[%s801_s0 + $0x24] sm:$0xf]  ;;  %v434_v47 = vld [vmem:[%s801_s0 + $0x30] sm:$0xf0]  ;;  %v440_v48 = vld [vmem:[%s801_s0 + $0x28] sm:$0xf]  ;;  %v433_v52 = vor.u32 %v580_v45, %v432_v44 }
  0x10   :  { %363 = vmatpush.bf16.msra.mxu2 %v602_v14  ;;  %v581_v49 = vld [vmem:[%s801_s0 + $0x34] sm:$0xf0]  ;;  %v579_v50 = vld [vmem:[%s801_s0 + $0x2c] sm:$0xf]  ;;  %v442_v51 = vld [vmem:[%s801_s0 + $0x38] sm:$0xf0]  ;;  %v437_v53 = vor.u32 %v578_v46, %v434_v47 }
  0x11   :  { %382 = vmatpush.bf16.msra.mxu3 %v610_v15  ;;  %v441_v54 = vor.u32 %v581_v49, %v440_v48  ;;  %v445_v55 = vor.u32 %v579_v50, %v442_v51  ;;  %v625_v56 = vld [vmem:[%s800_s2] ss:$0 sm:$0xff] }
  0x12   :  { %326 = vmatpush.bf16.msra.mxu0 %v585_v16 }
  0x13   :  { %345 = vmatpush.bf16.msra.mxu1 %v593_v17 }
  0x14   :  { %364 = vmatpush.bf16.msra.mxu2 %v601_v18 }
  0x15   :  { %383 = vmatpush.bf16.msra.mxu3 %v609_v19 }
  0x16   :  { %327 = vmatpush.bf16.msra.mxu0 %v584_v20 }
  0x17   :  { %346 = vmatpush.bf16.msra.mxu1 %v592_v21 }
  0x18   :  { %365 = vmatpush.bf16.msra.mxu2 %v600_v22 }
  0x19   :  { %384 = vmatpush.bf16.msra.mxu3 %v608_v23 }
  0x1a   :  { %328 = vmatpush.bf16.msra.mxu0 %v583_v24 }
  0x1b   :  { %347 = vmatpush.bf16.msra.mxu1 %v591_v25 }
  0x1c   :  { %366 = vmatpush.bf16.msra.mxu2 %v599_v26 }
  0x1d   :  { %385 = vmatpush.bf16.msra.mxu3 %v607_v27 }
  0x1e   :  { %329 = vmatpush.bf16.msra.mxu0 %v582_v28 }
  0x1f   :  { %348 = vmatpush.bf16.msra.mxu1 %v590_v29 }
  0x20   :  { %367 = vmatpush.bf16.msra.mxu2 %v598_v30 }
  0x21   :  { %386 = vmatpush.bf16.msra.mxu3 %v606_v31  ;;  %330 = vmatmul.bf16.vlgmr.msra.gmra.mxu0 %v417_v40 }
  0x22   :  { %349 = vmatmul.bf16.vlgmr.msra.gmra.mxu1 %v421_v41 }
  0x23   :  { %368 = vmatmul.bf16.vlgmr.msra.gmra.mxu2 %v425_v42 }
  0x24   :  { %387 = vmatmul.bf16.vlgmr.msra.gmra.mxu3 %v429_v43 }
  0x31   :  { %335 = vmatmul.bf16.gmra.mxu0 %v433_v52 }
  0x32   :  { %354 = vmatmul.bf16.gmra.mxu1 %v437_v53 }
  0x33   :  { %373 = vmatmul.bf16.gmra.mxu2 %v441_v54 }
  0x34   :  { %392 = vmatmul.bf16.gmra.mxu3 %v445_v55 }
  0x9e   :  { %v331_v57 = vpop.f32.mrf.mxu0 }
  0x9f   :  { %v350_v58 = vpop.f32.mrf.mxu1  ;;  %v332_v59 = vadd.f32 %v625_v56, %v331_v57 }
  0xa1   :  { %v351_v62 = vadd.f32 %v350_v58, %v332_v59 }
  0xa6   :  { %v369_v60 = vpop.f32.mrf.mxu2  ;;  %v333_v63 = vpop.f32.mrf.mxu0 }
  0xa7   :  { %v388_v61 = vpop.f32.mrf.mxu3  ;;  %v352_v0 = vpop.f32.mrf.mxu1  ;;  %v334_v1 = vadd.f32 %v625_v56, %v333_v63  ;;  %v370_v2 = vadd.f32 %v369_v60, %v351_v62 }
  0xa9   :  { %v353_v3 = vadd.f32 %v352_v0, %v334_v1  ;;  %v389_v6 = vadd.f32 %v388_v61, %v370_v2 }
  0xab   :  { %v398_v11 = vmax.f32 %v389_v6, 0.0 }
  0xae   :  { %v371_v4 = vpop.f32.mrf.mxu2  ;;  %v336_v8 = vpop.f32.mrf.mxu0 }
  0xaf   :  { %v390_v5 = vpop.f32.mrf.mxu3  ;;  %v372_v7 = vadd.f32 %v371_v4, %v353_v3  ;;  %v355_v10 = vpop.f32.mrf.mxu1  ;;  %v337_v13 = vadd.f32 %v625_v56, %v336_v8 }
  0xb1   :  { %v391_v9 = vadd.f32 %v390_v5, %v372_v7  ;;  %v356_v17 = vadd.f32 %v355_v10, %v337_v13 }
  0xb3   :  { %v399_v12 = vmax.f32 %v391_v9, 0.0 }
  0xb5   :  { %v617_v14 = vpack.c.bf16 %v399_v12, %v398_v11 }
  0xb6   :  { %v374_v15 = vpop.f32.mrf.mxu2  ;;  %v338_v18 = vpop.f32.mrf.mxu0 }
  0xb7   :  { %v393_v16 = vpop.f32.mrf.mxu3  ;;  %618 = vst [vmem:[%s802_s3] sm:$0xff] %v617_v14   ;;  %v339_v19 = vadd.f32 %v625_v56, %v338_v18  ;;  %v375_v20 = vadd.f32 %v374_v15, %v356_v17  ;;  %v357_v21 = vpop.f32.mrf.mxu1 }
  0xb9   :  { %v358_v22 = vadd.f32 %v357_v21, %v339_v19  ;;  %v394_v24 = vadd.f32 %v393_v16, %v375_v20 }
  0xbb   :  { %v400_v28 = vmax.f32 %v394_v24, 0.0 }
  0xbe   :  { %v376_v23 = vpop.f32.mrf.mxu2 }
  0xbf   :  { %v377_v25 = vadd.f32 %v376_v23, %v358_v22  ;;  %v395_v26 = vpop.f32.mrf.mxu3 }
  0xc1   :  { %v396_v27 = vadd.f32 %v395_v26, %v377_v25 }
  0xc3   :  { %v401_v29 = vmax.f32 %v396_v27, 0.0 }
  0xc5   :  { %v622_v30 = vpack.c.bf16 %v401_v29, %v400_v28 }
  0xc7   :  { %624 = vst [vmem:[%s802_s3 + $0x8] sm:$0xff] %v622_v30  }

// kernel: net3conv_forward.7
= control target key start
LH: loop header
LB: loop body
LE: loop exit
PB: predicated region body
PF: predicated region fallthrough
CT: control target
= control target key end

     0   :  { %s1866_s1 = inlined_call_operand.vmem [shape: bf16[256,512], index: 1, kind: input, shape index: {}]   ;;  %s1867_s0 = inlined_call_operand.vmem [shape: bf16[8,256], index: 0, kind: input, shape index: {}]   ;;  %s1868_s3 = inlined_call_operand.vmem [shape: bf16[512,128], index: 3, kind: input, shape index: {}]   ;;  %s1869_s4 = inlined_call_operand.vmem [shape: f32[1,128], index: 4, kind: input, shape index: {}]   ;;  %s1870_s2 = inlined_call_operand.vmem [shape: f32[1,512], index: 2, kind: input, shape index: {}]   ;;  %s1871_s5 = inlined_call_operand.vmem [shape: f32[8,128], index: 5, kind: output, shape index: {}]  }
   0x1   :  { %v965_v0 = vld [vmem:[%s1866_s1 + $0xe0] sm:$0xf]  ;;  %v1265_v1 = vld [vmem:[%s1866_s1 + $0xec] sm:$0xf0]  ;;  %v1263_v5 = vld [vmem:[%s1866_s1 + $0xe4] sm:$0xf] }
   0x2   :  { %v1093_v2 = vld [vmem:[%s1866_s1 + $0x1e0] sm:$0xf]  ;;  %v966_v3 = vor.u32 %v1265_v1, %v965_v0  ;;  %v1297_v4 = vld [vmem:[%s1866_s1 + $0x1ec] sm:$0xf0]  ;;  %v967_v6 = vld [vmem:[%s1866_s1 + $0xf0] sm:$0xf0] }
   0x3   :  { %v1094_v7 = vor.u32 %v1297_v4, %v1093_v2  ;;  %v970_v8 = vor.u32 %v1263_v5, %v967_v6  ;;  %v1295_v9 = vld [vmem:[%s1866_s1 + $0x1e4] sm:$0xf]  ;;  %v1095_v10 = vld [vmem:[%s1866_s1 + $0x1f0] sm:$0xf0]  ;;  %v949_v11 = vld [vmem:[%s1866_s1 + $0xc0] sm:$0xf] }
   0x4   :  { %422 = vmatpush.bf16.msra.mxu0 %v966_v3  ;;  %v1098_v12 = vor.u32 %v1295_v9, %v1095_v10  ;;  %v1261_v13 = vld [vmem:[%s1866_s1 + $0xcc] sm:$0xf0]  ;;  %v1077_v14 = vld [vmem:[%s1866_s1 + $0x1c0] sm:$0xf]  ;;  %v1259_v18 = vld [vmem:[%s1866_s1 + $0xc4] sm:$0xf] }
   0x5   :  { %v1293_v15 = vld [vmem:[%s1866_s1 + $0x1cc] sm:$0xf0]  ;;  %435 = vmatpush.bf16.msra.mxu1 %v1094_v7  ;;  %448 = vmatpush.bf16.msra.mxu2 %v970_v8  ;;  %v950_v16 = vor.u32 %v1261_v13, %v949_v11  ;;  %v951_v19 = vld [vmem:[%s1866_s1 + $0xd0] sm:$0xf0]  ;;  %v1291_v20 = vld [vmem:[%s1866_s1 + $0x1c4] sm:$0xf] }
   0x6   :  { %v1078_v17 = vor.u32 %v1293_v15, %v1077_v14  ;;  %461 = vmatpush.bf16.msra.mxu3 %v1098_v12  ;;  %v954_v21 = vor.u32 %v1259_v18, %v951_v19  ;;  %v1079_v22 = vld [vmem:[%s1866_s1 + $0x1d0] sm:$0xf0]  ;;  %v933_v23 = vld [vmem:[%s1866_s1 + $0xa0] sm:$0xf]  ;;  %v1257_v24 = vld [vmem:[%s1866_s1 + $0xac] sm:$0xf0] }
   0x7   :  { %v1082_v25 = vor.u32 %v1291_v20, %v1079_v22  ;;  %v1061_v26 = vld [vmem:[%s1866_s1 + $0x1a0] sm:$0xf]  ;;  %v1289_v27 = vld [vmem:[%s1866_s1 + $0x1ac] sm:$0xf0]  ;;  %v1255_v28 = vld [vmem:[%s1866_s1 + $0xa4] sm:$0xf]  ;;  %v934_v29 = vor.u32 %v1257_v24, %v933_v23 }
   0x8   :  { %423 = vmatpush.bf16.msra.mxu0 %v950_v16  ;;  %v935_v30 = vld [vmem:[%s1866_s1 + $0xb0] sm:$0xf0]  ;;  %v1287_v31 = vld [vmem:[%s1866_s1 + $0x1a4] sm:$0xf]  ;;  %v1062_v33 = vor.u32 %v1289_v27, %v1061_v26  ;;  %v917_v35 = vld [vmem:[%s1866_s1 + $0x80] sm:$0xf] }
   0x9   :  { %v1063_v32 = vld [vmem:[%s1866_s1 + $0x1b0] sm:$0xf0]  ;;  %436 = vmatpush.bf16.msra.mxu1 %v1078_v17  ;;  %449 = vmatpush.bf16.msra.mxu2 %v954_v21  ;;  %v938_v34 = vor.u32 %v1255_v28, %v935_v30  ;;  %v1253_v36 = vld [vmem:[%s1866_s1 + $0x8c] sm:$0xf0]  ;;  %v1045_v37 = vld [vmem:[%s1866_s1 + $0x180] sm:$0xf] }
   0xa   :  { %462 = vmatpush.bf16.msra.mxu3 %v1082_v25  ;;  %v1066_v38 = vor.u32 %v1287_v31, %v1063_v32  ;;  %v1285_v39 = vld [vmem:[%s1866_s1 + $0x18c] sm:$0xf0]  ;;  %v1251_v40 = vld [vmem:[%s1866_s1 + $0x84] sm:$0xf]  ;;  %v919_v41 = vld [vmem:[%s1866_s1 + $0x90] sm:$0xf0]  ;;  %v918_v44 = vor.u32 %v1253_v36, %v917_v35 }
   0xb   :  { %v1283_v42 = vld [vmem:[%s1866_s1 + $0x184] sm:$0xf]  ;;  %v1047_v43 = vld [vmem:[%s1866_s1 + $0x190] sm:$0xf0]  ;;  %v1046_v45 = vor.u32 %v1285_v39, %v1045_v37  ;;  %v922_v46 = vor.u32 %v1251_v40, %v919_v41  ;;  %v901_v47 = vld [vmem:[%s1866_s1 + $0x60] sm:$0xf] }
   0xc   :  { %424 = vmatpush.bf16.msra.mxu0 %v934_v29  ;;  %v1249_v48 = vld [vmem:[%s1866_s1 + $0x6c] sm:$0xf0]  ;;  %v1029_v49 = vld [vmem:[%s1866_s1 + $0x160] sm:$0xf]  ;;  %v1050_v50 = vor.u32 %v1283_v42, %v1047_v43  ;;  %v1247_v52 = vld [vmem:[%s1866_s1 + $0x64] sm:$0xf] }
   0xd   :  { %437 = vmatpush.bf16.msra.mxu1 %v1062_v33  ;;  %450 = vmatpush.bf16.msra.mxu2 %v938_v34  ;;  %v1281_v51 = vld [vmem:[%s1866_s1 + $0x16c] sm:$0xf0]  ;;  %v903_v53 = vld [vmem:[%s1866_s1 + $0x70] sm:$0xf0]  ;;  %v1279_v54 = vld [vmem:[%s1866_s1 + $0x164] sm:$0xf]  ;;  %v902_v56 = vor.u32 %v1249_v48, %v901_v47 }
   0xe   :  { %463 = vmatpush.bf16.msra.mxu3 %v1066_v38  ;;  %v1031_v55 = vld [vmem:[%s1866_s1 + $0x170] sm:$0xf0]  ;;  %v1030_v57 = vor.u32 %v1281_v51, %v1029_v49  ;;  %v906_v58 = vor.u32 %v1247_v52, %v903_v53  ;;  %v885_v59 = vld [vmem:[%s1866_s1 + $0x40] sm:$0xf]  ;;  %v1245_v60 = vld [vmem:[%s1866_s1 + $0x4c] sm:$0xf0] }
   0xf   :  { %v1013_v61 = vld [vmem:[%s1866_s1 + $0x140] sm:$0xf]  ;;  %v1034_v62 = vor.u32 %v1279_v54, %v1031_v55  ;;  %v1277_v63 = vld [vmem:[%s1866_s1 + $0x14c] sm:$0xf0]  ;;  %v1243_v0 = vld [vmem:[%s1866_s1 + $0x44] sm:$0xf]  ;;  %v886_v4 = vor.u32 %v1245_v60, %v885_v59 }
  0x10   :  { %425 = vmatpush.bf16.msra.mxu0 %v918_v44  ;;  %v887_v1 = vld [vmem:[%s1866_s1 + $0x50] sm:$0xf0]  ;;  %v1275_v2 = vld [vmem:[%s1866_s1 + $0x144] sm:$0xf]  ;;  %v1014_v5 = vor.u32 %v1277_v63, %v1013_v61  ;;  %v869_v7 = vld [vmem:[%s1866_s1 + $0x20] sm:$0xf] }
  0x11   :  { %438 = vmatpush.bf16.msra.mxu1 %v1046_v45  ;;  %451 = vmatpush.bf16.msra.mxu2 %v922_v46  ;;  %v1015_v3 = vld [vmem:[%s1866_s1 + $0x150] sm:$0xf0]  ;;  %v890_v6 = vor.u32 %v1243_v0, %v887_v1  ;;  %v1241_v8 = vld [vmem:[%s1866_s1 + $0x2c] sm:$0xf0]  ;;  %v997_v9 = vld [vmem:[%s1866_s1 + $0x120] sm:$0xf] }
  0x12   :  { %464 = vmatpush.bf16.msra.mxu3 %v1050_v50  ;;  %v1018_v10 = vor.u32 %v1275_v2, %v1015_v3  ;;  %v1273_v11 = vld [vmem:[%s1866_s1 + $0x12c] sm:$0xf0]  ;;  %v1239_v12 = vld [vmem:[%s1866_s1 + $0x24] sm:$0xf]  ;;  %v871_v13 = vld [vmem:[%s1866_s1 + $0x30] sm:$0xf0]  ;;  %v870_v16 = vor.u32 %v1241_v8, %v869_v7 }
  0x13   :  { %v1271_v14 = vld [vmem:[%s1866_s1 + $0x124] sm:$0xf]  ;;  %v999_v15 = vld [vmem:[%s1866_s1 + $0x130] sm:$0xf0]  ;;  %v853_v17 = vld [vmem:[%s1866_s1] sm:$0xf]  ;;  %v998_v20 = vor.u32 %v1273_v11, %v997_v9  ;;  %v874_v21 = vor.u32 %v1239_v12, %v871_v13 }
  0x14   :  { %426 = vmatpush.bf16.msra.mxu0 %v902_v56  ;;  %v1237_v18 = vld [vmem:[%s1866_s1 + $0xc] sm:$0xf0]  ;;  %v981_v19 = vld [vmem:[%s1866_s1 + $0x100] sm:$0xf]  ;;  %v1235_v23 = vld [vmem:[%s1866_s1 + $0x4] sm:$0xf]  ;;  %v1002_v25 = vor.u32 %v1271_v14, %v999_v15 }
  0x15   :  { %439 = vmatpush.bf16.msra.mxu1 %v1030_v57  ;;  %452 = vmatpush.bf16.msra.mxu2 %v906_v58  ;;  %v1269_v22 = vld [vmem:[%s1866_s1 + $0x10c] sm:$0xf0]  ;;  %v855_v24 = vld [vmem:[%s1866_s1 + $0x10] sm:$0xf0]  ;;  %v1267_v26 = vld [vmem:[%s1866_s1 + $0x104] sm:$0xf]  ;;  %v854_v32 = vor.u32 %v1237_v18, %v853_v17 }
  0x16   :  { %465 = vmatpush.bf16.msra.mxu3 %v1034_v62  ;;  %v983_v27 = vld [vmem:[%s1866_s1 + $0x110] sm:$0xf0]  ;;  %v973_v28 = vld [vmem:[%s1866_s1 + $0xe8] sm:$0xf]  ;;  %v1266_v29 = vld [vmem:[%s1866_s1 + $0xf4] sm:$0xf0]  ;;  %v982_v37 = vor.u32 %v1269_v22, %v981_v19  ;;  %v858_v38 = vor.u32 %v1235_v23, %v855_v24 }
  0x17   :  { %v1101_v30 = vld [vmem:[%s1866_s1 + $0x1e8] sm:$0xf]  ;;  %v20_v31 = vld [vmem:[%s1867_s0] sm:$0xff]  ;;  %v1298_v33 = vld [vmem:[%s1866_s1 + $0x1f4] sm:$0xf0]  ;;  %v986_v42 = vor.u32 %v1267_v26, %v983_v27  ;;  %v974_v43 = vor.u32 %v1266_v29, %v973_v28 }
  0x18   :  { %427 = vmatpush.bf16.msra.mxu0 %v886_v4  ;;  %v1264_v34 = vld [vmem:[%s1866_s1 + $0xec] sm:$0xf]  ;;  %v975_v35 = vld [vmem:[%s1866_s1 + $0xf8] sm:$0xf0]  ;;  %v96_v36 = vunpack.c.l.b16 %v20_v31  ;;  %v97_v41 = vunpack.c.h.b16 %v20_v31  ;;  %v1102_v44 = vor.u32 %v1298_v33, %v1101_v30  ;;  %v957_v46 = vld [vmem:[%s1866_s1 + $0xc8] sm:$0xf] }
  0x19   :  { %440 = vmatpush.bf16.msra.mxu1 %v1014_v5  ;;  %453 = vmatpush.bf16.msra.mxu2 %v890_v6  ;;  %v1296_v39 = vld [vmem:[%s1866_s1 + $0x1ec] sm:$0xf]  ;;  %v1103_v40 = vld [vmem:[%s1866_s1 + $0x1f8] sm:$0xf0]  ;;  %v978_v45 = vor.u32 %v1264_v34, %v975_v35  ;;  %v1262_v47 = vld [vmem:[%s1866_s1 + $0xd4] sm:$0xf0] }
  0x1a   :  { %466 = vmatpush.bf16.msra.mxu3 %v1018_v10  ;;  %v1085_v48 = vld [vmem:[%s1866_s1 + $0x1c8] sm:$0xf]  ;;  %v1106_v49 = vor.u32 %v1296_v39, %v1103_v40  ;;  %v1294_v50 = vld [vmem:[%s1866_s1 + $0x1d4] sm:$0xf0]  ;;  %v1260_v51 = vld [vmem:[%s1866_s1 + $0xcc] sm:$0xf]  ;;  %v1599_v53 = vpack.c.b16 %v96_v36, %v96_v36  ;;  %v1607_v56 = vpack.c.b16 %v97_v41, %v97_v41  ;;  %v958_v57 = vor.u32 %v1262_v47, %v957_v46 }
  0x1b   :  { %v959_v52 = vld [vmem:[%s1866_s1 + $0xd8] sm:$0xf0]  ;;  %v1292_v54 = vld [vmem:[%s1866_s1 + $0x1cc] sm:$0xf]  ;;  %v1086_v58 = vor.u32 %v1294_v50, %v1085_v48  ;;  %v941_v60 = vld [vmem:[%s1866_s1 + $0xa8] sm:$0xf] }
  0x1c   :  { %428 = vmatpush.bf16.msra.mxu0 %v870_v16  ;;  %v1087_v55 = vld [vmem:[%s1866_s1 + $0x1d8] sm:$0xf0]  ;;  %v962_v59 = vor.u32 %v1260_v51, %v959_v52  ;;  %v1258_v61 = vld [vmem:[%s1866_s1 + $0xb4] sm:$0xf0]  ;;  %v1069_v62 = vld [vmem:[%s1866_s1 + $0x1a8] sm:$0xf] }
  0x1d   :  { %441 = vmatpush.bf16.msra.mxu1 %v998_v20  ;;  %454 = vmatpush.bf16.msra.mxu2 %v874_v21  ;;  %v1090_v63 = vor.u32 %v1292_v54, %v1087_v55  ;;  %v1290_v0 = vld [vmem:[%s1866_s1 + $0x1b4] sm:$0xf0]  ;;  %v1256_v1 = vld [vmem:[%s1866_s1 + $0xac] sm:$0xf]  ;;  %v943_v2 = vld [vmem:[%s1866_s1 + $0xb8] sm:$0xf0]  ;;  %v942_v5 = vor.u32 %v1258_v61, %v941_v60 }
  0x1e   :  { %467 = vmatpush.bf16.msra.mxu3 %v1002_v25  ;;  %v1288_v3 = vld [vmem:[%s1866_s1 + $0x1ac] sm:$0xf]  ;;  %v1071_v4 = vld [vmem:[%s1866_s1 + $0x1b8] sm:$0xf0]  ;;  %v1070_v6 = vor.u32 %v1290_v0, %v1069_v62  ;;  %v946_v7 = vor.u32 %v1256_v1, %v943_v2  ;;  %v925_v8 = vld [vmem:[%s1866_s1 + $0x88] sm:$0xf] }
  0x1f   :  { %v1254_v9 = vld [vmem:[%s1866_s1 + $0x94] sm:$0xf0]  ;;  %v1053_v10 = vld [vmem:[%s1866_s1 + $0x188] sm:$0xf]  ;;  %v1074_v11 = vor.u32 %v1288_v3, %v1071_v4  ;;  %v1252_v13 = vld [vmem:[%s1866_s1 + $0x8c] sm:$0xf] }
  0x20   :  { %429 = vmatpush.bf16.msra.mxu0 %v854_v32  ;;  %v1286_v12 = vld [vmem:[%s1866_s1 + $0x194] sm:$0xf0]  ;;  %v927_v14 = vld [vmem:[%s1866_s1 + $0x98] sm:$0xf0]  ;;  %v1284_v15 = vld [vmem:[%s1866_s1 + $0x18c] sm:$0xf]  ;;  %v926_v17 = vor.u32 %v1254_v9, %v925_v8 }
  0x21   :  { %442 = vmatpush.bf16.msra.mxu1 %v982_v37  ;;  %455 = vmatpush.bf16.msra.mxu2 %v858_v38  ;;  %v1055_v16 = vld [vmem:[%s1866_s1 + $0x198] sm:$0xf0]  ;;  %v1054_v18 = vor.u32 %v1286_v12, %v1053_v10  ;;  %v930_v19 = vor.u32 %v1252_v13, %v927_v14  ;;  %v909_v20 = vld [vmem:[%s1866_s1 + $0x68] sm:$0xf]  ;;  %v1250_v21 = vld [vmem:[%s1866_s1 + $0x74] sm:$0xf0] }
  0x22   :  { %468 = vmatpush.bf16.msra.mxu3 %v986_v42  ;;  %v1037_v22 = vld [vmem:[%s1866_s1 + $0x168] sm:$0xf]  ;;  %v1058_v23 = vor.u32 %v1284_v15, %v1055_v16  ;;  %v1282_v24 = vld [vmem:[%s1866_s1 + $0x174] sm:$0xf0]  ;;  %v1248_v25 = vld [vmem:[%s1866_s1 + $0x6c] sm:$0xf]  ;;  %v910_v29 = vor.u32 %v1250_v21, %v909_v20 }
  0x23   :  { %430 = vmatmul.bf16.vlgmr.msra.gmra.mxu0 %v1599_v53  ;;  %v911_v26 = vld [vmem:[%s1866_s1 + $0x78] sm:$0xf0]  ;;  %v1280_v27 = vld [vmem:[%s1866_s1 + $0x16c] sm:$0xf]  ;;  %v1038_v30 = vor.u32 %v1282_v24, %v1037_v22  ;;  %v893_v32 = vld [vmem:[%s1866_s1 + $0x48] sm:$0xf] }
  0x24   :  { %474 = vmatpush.bf16.msrb.mxu0 %v974_v43  ;;  %456 = vmatmul.bf16.vlgmr.msra.gmra.mxu2 %v1599_v53  ;;  %v1039_v28 = vld [vmem:[%s1866_s1 + $0x178] sm:$0xf0]  ;;  %v914_v31 = vor.u32 %v1248_v25, %v911_v26  ;;  %v1246_v33 = vld [vmem:[%s1866_s1 + $0x54] sm:$0xf0]  ;;  %v1021_v34 = vld [vmem:[%s1866_s1 + $0x148] sm:$0xf] }
  0x25   :  { %487 = vmatpush.bf16.msrb.mxu1 %v1102_v44  ;;  %500 = vmatpush.bf16.msrb.mxu2 %v978_v45  ;;  %v1042_v35 = vor.u32 %v1280_v27, %v1039_v28  ;;  %v1278_v36 = vld [vmem:[%s1866_s1 + $0x154] sm:$0xf0]  ;;  %v1244_v37 = vld [vmem:[%s1866_s1 + $0x4c] sm:$0xf]  ;;  %v895_v38 = vld [vmem:[%s1866_s1 + $0x58] sm:$0xf0]  ;;  %v894_v41 = vor.u32 %v1246_v33, %v893_v32 }
  0x26   :  { %513 = vmatpush.bf16.msrb.mxu3 %v1106_v49  ;;  %443 = vmatmul.bf16.vlgmr.msra.gmra.mxu1 %v1607_v56  ;;  %v1276_v39 = vld [vmem:[%s1866_s1 + $0x14c] sm:$0xf]  ;;  %v1023_v40 = vld [vmem:[%s1866_s1 + $0x158] sm:$0xf0]  ;;  %v1022_v42 = vor.u32 %v1278_v36, %v1021_v34  ;;  %v898_v43 = vor.u32 %v1244_v37, %v895_v38  ;;  %v877_v44 = vld [vmem:[%s1866_s1 + $0x28] sm:$0xf] }
  0x27   :  { %469 = vmatmul.bf16.vlgmr.msra.gmra.mxu3 %v1607_v56  ;;  %v1242_v45 = vld [vmem:[%s1866_s1 + $0x34] sm:$0xf0]  ;;  %v1005_v46 = vld [vmem:[%s1866_s1 + $0x128] sm:$0xf]  ;;  %v1026_v47 = vor.u32 %v1276_v39, %v1023_v40  ;;  %v1240_v49 = vld [vmem:[%s1866_s1 + $0x2c] sm:$0xf] }
  0x28   :  { %475 = vmatpush.bf16.msrb.mxu0 %v958_v57  ;;  %v1274_v48 = vld [vmem:[%s1866_s1 + $0x134] sm:$0xf0]  ;;  %v879_v50 = vld [vmem:[%s1866_s1 + $0x38] sm:$0xf0]  ;;  %v1272_v51 = vld [vmem:[%s1866_s1 + $0x12c] sm:$0xf]  ;;  %v878_v54 = vor.u32 %v1242_v45, %v877_v44 }
  0x29   :  { %488 = vmatpush.bf16.msrb.mxu1 %v1086_v58  ;;  %501 = vmatpush.bf16.msrb.mxu2 %v962_v59  ;;  %v1007_v52 = vld [vmem:[%s1866_s1 + $0x138] sm:$0xf0]  ;;  %v1006_v55 = vor.u32 %v1274_v48, %v1005_v46  ;;  %v882_v57 = vor.u32 %v1240_v49, %v879_v50  ;;  %v861_v58 = vld [vmem:[%s1866_s1 + $0x8] sm:$0xf]  ;;  %v1238_v59 = vld [vmem:[%s1866_s1 + $0x14] sm:$0xf0] }
  0x2a   :  { %514 = vmatpush.bf16.msrb.mxu3 %v1090_v63  ;;  %v989_v60 = vld [vmem:[%s1866_s1 + $0x108] sm:$0xf]  ;;  %v1010_v61 = vor.u32 %v1272_v51, %v1007_v52  ;;  %v1270_v62 = vld [vmem:[%s1866_s1 + $0x114] sm:$0xf0]  ;;  %v1236_v63 = vld [vmem:[%s1866_s1 + $0xc] sm:$0xf]  ;;  %v862_v3 = vor.u32 %v1238_v59, %v861_v58 }
  0x2b   :  { %v863_v0 = vld [vmem:[%s1866_s1 + $0x18] sm:$0xf0]  ;;  %v1268_v1 = vld [vmem:[%s1866_s1 + $0x10c] sm:$0xf]  ;;  %v990_v4 = vor.u32 %v1270_v62, %v989_v60  ;;  %v1305_v10 = vld [vmem:[%s1868_s3 + $0x30] sm:$0xff] }
  0x2c   :  { %476 = vmatpush.bf16.msrb.mxu0 %v942_v5  ;;  %v991_v2 = vld [vmem:[%s1866_s1 + $0x118] sm:$0xf0]  ;;  %v866_v5 = vor.u32 %v1236_v63, %v863_v0  ;;  %v1304_v12 = vld [vmem:[%s1868_s3 + $0x28] sm:$0xff]  ;;  %v1303_v14 = vld [vmem:[%s1868_s3 + $0x20] sm:$0xff] }
  0x2d   :  { %489 = vmatpush.bf16.msrb.mxu1 %v1070_v6  ;;  %502 = vmatpush.bf16.msrb.mxu2 %v946_v7  ;;  %v994_v6 = vor.u32 %v1268_v1, %v991_v2  ;;  %v1306_v7 = vld [vmem:[%s1868_s3 + $0x38] sm:$0xff]  ;;  %v1312_v13 = vld [vmem:[%s1868_s3 + $0x68] sm:$0xff]  ;;  %v1301_v16 = vld [vmem:[%s1868_s3 + $0x10] sm:$0xff] }
  0x2e   :  { %515 = vmatpush.bf16.msrb.mxu3 %v1074_v11  ;;  %v1314_v8 = vld [vmem:[%s1868_s3 + $0x78] sm:$0xff]  ;;  %v1313_v11 = vld [vmem:[%s1868_s3 + $0x70] sm:$0xff]  ;;  %v1308_v20 = vld [vmem:[%s1868_s3 + $0x48] sm:$0xff] }
  0x2f   :  { %v1322_v9 = vld [vmem:[%s1868_s3 + $0xb8] sm:$0xff]  ;;  %v1320_v22 = vld [vmem:[%s1868_s3 + $0xa8] sm:$0xff]  ;;  %v1307_v24 = vld [vmem:[%s1868_s3 + $0x40] sm:$0xff] }
  0x30   :  { %477 = vmatpush.bf16.msrb.mxu0 %v926_v17  ;;  %v1310_v15 = vld [vmem:[%s1868_s3 + $0x58] sm:$0xff]  ;;  %v1309_v17 = vld [vmem:[%s1868_s3 + $0x50] sm:$0xff]  ;;  %v1319_v26 = vld [vmem:[%s1868_s3 + $0xa0] sm:$0xff] }
  0x31   :  { %490 = vmatpush.bf16.msrb.mxu1 %v1054_v18  ;;  %503 = vmatpush.bf16.msrb.mxu2 %v930_v19  ;;  %v1321_v18 = vld [vmem:[%s1868_s3 + $0xb0] sm:$0xff]  ;;  %v1300_v19 = vld [vmem:[%s1868_s3 + $0x8] sm:$0xff]  ;;  %v1330_v21 = vld [vmem:[%s1868_s3 + $0xf8] sm:$0xff] }
  0x32   :  { %516 = vmatpush.bf16.msrb.mxu3 %v1058_v23  ;;  %v1299_v23 = vld [vmem:[%s1868_s3] sm:$0xff]  ;;  %v1329_v25 = vld [vmem:[%s1868_s3 + $0xf0] sm:$0xff]  ;;  %v1328_v27 = vld [vmem:[%s1868_s3 + $0xe8] sm:$0xff] }
  0x33   :  { %v1318_v28 = vld [vmem:[%s1868_s3 + $0x98] sm:$0xff]  ;;  %v1316_v34 = vld [vmem:[%s1868_s3 + $0x88] sm:$0xff]  ;;  %v1325_v36 = vld [vmem:[%s1868_s3 + $0xd0] sm:$0xff] }
  0x34   :  { %478 = vmatpush.bf16.msrb.mxu0 %v910_v29  ;;  %v1327_v29 = vld [vmem:[%s1868_s3 + $0xe0] sm:$0xff]  ;;  %v1326_v32 = vld [vmem:[%s1868_s3 + $0xd8] sm:$0xff] }
  0x35   :  { %491 = vmatpush.bf16.msrb.mxu1 %v1038_v30  ;;  %504 = vmatpush.bf16.msrb.mxu2 %v914_v31  ;;  %v1317_v30 = vld [vmem:[%s1868_s3 + $0x90] sm:$0xff]  ;;  %v85_v31 = vld [vmem:[%s1870_s2] sm:$0xf] }
  0x36   :  { %517 = vmatpush.bf16.msrb.mxu3 %v1042_v35  ;;  %v87_v33 = vperm.slane %v85_v31, 0  ;;  %v88_v39 = vperm.slane %v85_v31, 1  ;;  %v1315_v40 = vld [vmem:[%s1868_s3 + $0x80] sm:$0xff]  ;;  %v89_v58 = vperm.slane %v85_v31, 2  ;;  %v90_v63 = vperm.slane %v85_v31, 3 }
  0x37   :  { %v1323_v50 = vld [vmem:[%s1868_s3 + $0xc0] sm:$0xff] }
  0x38   :  { %479 = vmatpush.bf16.msrb.mxu0 %v894_v41 }
  0x39   :  { %492 = vmatpush.bf16.msrb.mxu1 %v1022_v42  ;;  %505 = vmatpush.bf16.msrb.mxu2 %v898_v43  ;;  %v1324_v42 = vld [vmem:[%s1868_s3 + $0xc8] sm:$0xff] }
  0x3a   :  { %518 = vmatpush.bf16.msrb.mxu3 %v1026_v47 }
  0x3c   :  { %480 = vmatpush.bf16.msrb.mxu0 %v878_v54 }
  0x3d   :  { %493 = vmatpush.bf16.msrb.mxu1 %v1006_v55  ;;  %506 = vmatpush.bf16.msrb.mxu2 %v882_v57 }
  0x3e   :  { %519 = vmatpush.bf16.msrb.mxu3 %v1010_v61 }
  0x40   :  { %481 = vmatpush.bf16.msrb.mxu0 %v862_v3 }
  0x41   :  { %494 = vmatpush.bf16.msrb.mxu1 %v990_v4  ;;  %507 = vmatpush.bf16.msrb.mxu2 %v866_v5 }
  0x42   :  { %520 = vmatpush.bf16.msrb.mxu3 %v994_v6 }
  0x43   :  { %482 = vmatmul.bf16.vlgmr.msrb.gmra.mxu0 %v1599_v53 }
  0x44   :  { %794 = vmatpush.bf16.msra.mxu0 %v1306_v7  ;;  %495 = vmatmul.bf16.vlgmr.msrb.gmra.mxu1 %v1607_v56 }
  0x45   :  { %807 = vmatpush.bf16.msra.mxu1 %v1314_v8  ;;  %508 = vmatmul.bf16.vlgmr.msrb.gmra.mxu2 %v1599_v53  ;;  %v1311_v53 = vld [vmem:[%s1868_s3 + $0x60] sm:$0xff] }
  0x46   :  { %521 = vmatmul.bf16.vlgmr.msrb.gmra.mxu3 %v1607_v56  ;;  %820 = vmatpush.bf16.msra.mxu2 %v1322_v9  ;;  %v1302_v56 = vld [vmem:[%s1868_s3 + $0x18] sm:$0xff] }
  0x47   :  { %833 = vmatpush.bf16.msra.mxu3 %v1330_v21 }
  0x48   :  { %795 = vmatpush.bf16.msra.mxu0 %v1305_v10 }
  0x49   :  { %808 = vmatpush.bf16.msra.mxu1 %v1313_v11 }
  0x4a   :  { %821 = vmatpush.bf16.msra.mxu2 %v1321_v18 }
  0x4b   :  { %834 = vmatpush.bf16.msra.mxu3 %v1329_v25 }
  0x4c   :  { %796 = vmatpush.bf16.msra.mxu0 %v1304_v12 }
  0x4d   :  { %809 = vmatpush.bf16.msra.mxu1 %v1312_v13 }
  0x4e   :  { %822 = vmatpush.bf16.msra.mxu2 %v1320_v22 }
  0x4f   :  { %835 = vmatpush.bf16.msra.mxu3 %v1328_v27 }
  0x50   :  { %797 = vmatpush.bf16.msra.mxu0 %v1303_v14 }
  0x51   :  { %810 = vmatpush.bf16.msra.mxu1 %v1311_v53 }
  0x52   :  { %823 = vmatpush.bf16.msra.mxu2 %v1319_v26 }
  0x53   :  { %836 = vmatpush.bf16.msra.mxu3 %v1327_v29 }
  0x54   :  { %798 = vmatpush.bf16.msra.mxu0 %v1302_v56  ;;  %v1331_v56 = vld [vmem:[%s1869_s4] ss:$0 sm:$0xff] }
  0x55   :  { %811 = vmatpush.bf16.msra.mxu1 %v1310_v15 }
  0x56   :  { %824 = vmatpush.bf16.msra.mxu2 %v1318_v28 }
  0x57   :  { %837 = vmatpush.bf16.msra.mxu3 %v1326_v32 }
  0x58   :  { %799 = vmatpush.bf16.msra.mxu0 %v1301_v16 }
  0x59   :  { %812 = vmatpush.bf16.msra.mxu1 %v1309_v17 }
  0x5a   :  { %825 = vmatpush.bf16.msra.mxu2 %v1317_v30 }
  0x5b   :  { %838 = vmatpush.bf16.msra.mxu3 %v1325_v36 }
  0x5c   :  { %800 = vmatpush.bf16.msra.mxu0 %v1300_v19 }
  0x5d   :  { %813 = vmatpush.bf16.msra.mxu1 %v1308_v20 }
  0x5e   :  { %826 = vmatpush.bf16.msra.mxu2 %v1316_v34 }
  0x5f   :  { %839 = vmatpush.bf16.msra.mxu3 %v1324_v42 }
  0x60   :  { %801 = vmatpush.bf16.msra.mxu0 %v1299_v23 }
  0x61   :  { %814 = vmatpush.bf16.msra.mxu1 %v1307_v24 }
  0x62   :  { %827 = vmatpush.bf16.msra.mxu2 %v1315_v40 }
  0x63   :  { %840 = vmatpush.bf16.msra.mxu3 %v1323_v50 }
  0xa0   :  { %v431_v35 = vpop.f32.mrf.mxu0 }
  0xa1   :  { %v432_v37 = vadd.f32 %v431_v35, %v87_v33 }
  0xa3   :  { %v444_v38 = vpop.f32.mrf.mxu1 }
  0xa4   :  { %v445_v41 = vadd.f32 %v444_v38, %v432_v37 }
  0xa6   :  { %v526_v44 = vmax.f32 %v445_v41, 0.0 }
  0xa7   :  { %v457_v43 = vpop.f32.mrf.mxu2 }
  0xa8   :  { %v458_v45 = vadd.f32 %v457_v43, %v88_v39  ;;  %v530_v47 = vpack.c.bf16 %v526_v44, %v526_v44  ;;  %v433_v49 = vpop.f32.mrf.mxu0 }
  0xaa   :  { %v470_v46 = vpop.f32.mrf.mxu3  ;;  %802 = vmatmul.bf16.vlgmr.msra.gmra.mxu0 %v530_v47 }
  0xab   :  { %v471_v48 = vadd.f32 %v470_v46, %v458_v45  ;;  %v446_v51 = vpop.f32.mrf.mxu1 }
  0xad   :  { %v527_v52 = vmax.f32 %v471_v48, 0.0 }
  0xaf   :  { %v531_v54 = vpack.c.bf16 %v527_v52, %v527_v52  ;;  %v459_v55 = vpop.f32.mrf.mxu2 }
  0xb1   :  { %815 = vmatmul.bf16.vlgmr.msra.gmra.mxu1 %v531_v54 }
  0xb2   :  { %v472_v57 = vpop.f32.mrf.mxu3 }
  0xc0   :  { %v483_v59 = vpop.f32.mrf.mxu0 }
  0xc1   :  { %v484_v60 = vadd.f32 %v483_v59, %v89_v58  ;;  %v496_v61 = vpop.f32.mrf.mxu1 }
  0xc3   :  { %v497_v62 = vadd.f32 %v496_v61, %v484_v60 }
  0xc5   :  { %v528_v0 = vmax.f32 %v497_v62, 0.0 }
  0xc7   :  { %v532_v1 = vpack.c.bf16 %v528_v0, %v528_v0 }
  0xc8   :  { %v509_v2 = vpop.f32.mrf.mxu2  ;;  %v485_v5 = vpop.f32.mrf.mxu0 }
  0xc9   :  { %v510_v3 = vadd.f32 %v509_v2, %v90_v63  ;;  %v522_v4 = vpop.f32.mrf.mxu3  ;;  %v498_v6 = vpop.f32.mrf.mxu1  ;;  %828 = vmatmul.bf16.vlgmr.msra.gmra.mxu2 %v532_v1 }
  0xcb   :  { %v523_v7 = vadd.f32 %v522_v4, %v510_v3 }
  0xcd   :  { %v529_v8 = vmax.f32 %v523_v7, 0.0 }
  0xcf   :  { %v533_v9 = vpack.c.bf16 %v529_v8, %v529_v8 }
  0xd0   :  { %v511_v10 = vpop.f32.mrf.mxu2 }
  0xd1   :  { %v524_v11 = vpop.f32.mrf.mxu3  ;;  %841 = vmatmul.bf16.vlgmr.msra.gmra.mxu3 %v533_v9 }
 0x127   :  { %v803_v12 = vpop.f32.mrf.mxu0 }
 0x128   :  { %v804_v15 = vadd.f32 %v1331_v56, %v803_v12 }
 0x12e   :  { %v816_v13 = vpop.f32.mrf.mxu1 }
 0x12f   :  { %v805_v14 = vpop.f32.mrf.mxu0  ;;  %v817_v17 = vadd.f32 %v816_v13, %v804_v15 }
 0x136   :  { %v818_v53 = vpop.f32.mrf.mxu1 }
 0x14c   :  { %v829_v16 = vpop.f32.mrf.mxu2 }
 0x14d   :  { %v830_v18 = vadd.f32 %v829_v16, %v817_v17 }
 0x154   :  { %v842_v19 = vpop.f32.mrf.mxu3  ;;  %v831_v21 = vpop.f32.mrf.mxu2 }
 0x155   :  { %v843_v20 = vadd.f32 %v842_v19, %v830_v18 }
 0x157   :  { %846 = vst [vmem:[%s1871_s5] sm:$0xff] %v843_v20 }
 0x15c   :  { %v844_v22 = vpop.f32.mrf.mxu3 }

</bundles_post_ra>
